<compile_context>
chip_gen: v6e
topology: v6e:2x2x1
jax: 0.10.0
libtpu: 0.0.40
codegen_flags: <defaults>
</compile_context>

<pallas_src>
import functools

import numpy as np
import jax
import jax.numpy as jnp
from jax.experimental import pallas as pl
from jax.experimental.pallas import tpu as pltpu

MATMUL_DTYPE = jnp.bfloat16          # MXU operand dtype; accumulation is f32
VMEM_LIMIT = 32 * 1024 * 1024        # fits scoped VMEM on v5e/v6e/v7x


def _round_up(x, m):
    return (x + m - 1) // m * m


def _const_spec(shape):
    """Whole-array block, identical for every grid step (weights / biases)."""
    return pl.BlockSpec(shape, lambda i: (0,) * len(shape))


# ------------------------------------------------------------------
# Kernel 1: tiled matmul + bias + ReLU   (first, stride-2 conv as im2col)
# ------------------------------------------------------------------

def _matmul_bias_relu_kernel(x_ref, w_ref, b_ref, o_ref):
    acc = jnp.dot(x_ref[...], w_ref[...], preferred_element_type=jnp.float32)
    acc = jnp.maximum(acc + b_ref[...], 0.0)
    o_ref[...] = acc.astype(o_ref.dtype)


def matmul_bias_relu(x, w, b, *, tile_m=512):
    """(M,K)@(K,N)+b, ReLU.  Tiled over M rows; weights stay resident."""
    M, K = x.shape
    N = w.shape[1]
    tm = min(tile_m, _round_up(M, 16))
    Mp = _round_up(M, tm)
    if Mp != M:
        x = jnp.pad(x, ((0, Mp - M), (0, 0)))
    out = pl.pallas_call(
        _matmul_bias_relu_kernel,
        out_shape=jax.ShapeDtypeStruct((Mp, N), MATMUL_DTYPE),
        grid=(Mp // tm,),
        in_specs=[pl.BlockSpec((tm, K), lambda i: (i, 0)),
                  _const_spec((K, N)),
                  _const_spec((1, N))],
        out_specs=pl.BlockSpec((tm, N), lambda i: (i, 0)),
        compiler_params=pltpu.CompilerParams(
            dimension_semantics=("parallel",),
            vmem_limit_bytes=VMEM_LIMIT),
    )(x, w, b.reshape(1, N))
    return out[:M]


# ------------------------------------------------------------------
# Kernel 2: 3x3 stride-1 conv on pitch-P flattened activations ("wide conv").
#           Patches are built in-kernel; TB images per grid step.
# ------------------------------------------------------------------

def _conv3x3_s1_wide_kernel(x_ref, w_ref, b_ref, o_ref, *, pitch, m_valid):
    TB, R, F = o_ref.shape
    for t in range(TB):                                  # static, unrolled
        acc = jnp.zeros((m_valid, F), jnp.float32)
        for kh in range(3):
            for kw in range(3):
                off = kh * pitch + kw
                sl = x_ref[t, off:off + m_valid, :]      # (m_valid, Cin)
                acc = acc + jnp.dot(sl, w_ref[kh * 3 + kw],
                                    preferred_element_type=jnp.float32)
        y = jnp.maximum(acc + b_ref[...], 0.0).astype(o_ref.dtype)
        o_ref[t, 0:m_valid, :] = y
        # Zero the tail rows so no uninitialised (possibly NaN) data can leak
        # into later matmuls even against zero weight rows.
        o_ref[t, m_valid:, :] = jnp.zeros((R - m_valid, F), o_ref.dtype)


def conv3x3_s1_wide(act, w, b, *, pitch, tile_b=8):
    """act: (B, R, Cin) flattened on a pitch-`pitch` grid -> (B, R, F).
    Rows outside the shrinking valid region are harmless finite garbage; they
    are masked by zero rows of the remapped encoder fc weight."""
    B, R, C = act.shape
    F = w.shape[2]
    m_valid = R - 2 * pitch - 2
    TB = min(tile_b, B)
    Bp = _round_up(B, TB)
    if Bp != B:
        act = jnp.pad(act, ((0, Bp - B), (0, 0), (0, 0)))
    out = pl.pallas_call(
        functools.partial(_conv3x3_s1_wide_kernel, pitch=pitch, m_valid=m_valid),
        out_shape=jax.ShapeDtypeStruct((Bp, R, F), MATMUL_DTYPE),
        grid=(Bp // TB,),
        in_specs=[pl.BlockSpec((TB, R, C), lambda i: (i, 0, 0)),
                  _const_spec((9, C, F)),
                  _const_spec((1, F))],
        out_specs=pl.BlockSpec((TB, R, F), lambda i: (i, 0, 0)),
        compiler_params=pltpu.CompilerParams(
            dimension_semantics=("parallel",),
            vmem_limit_bytes=VMEM_LIMIT),
    )(act, w, b.reshape(1, F))
    return out[:B]


# ------------------------------------------------------------------
# Kernel 3: fused encoder fc + LayerNorm + trunk MLP + distribution head,
#           tiled over batch, single lane-dense packed output.
# ------------------------------------------------------------------

def _encoder_trunk_head_kernel(h_ref, fcw_ref, fcb_ref, g_ref, beta_ref,
                               w1_ref, b1_ref, w2_ref, b2_ref, w3_ref, b3_ref,
                               noise_ref, o_ref,
                               *, action_dim, log_std_min, log_std_max):
    A = action_dim
    # encoder fc + LayerNorm (stats in f32); output_logits=True -> no tanh
    z = jnp.dot(h_ref[...], fcw_ref[...], preferred_element_type=jnp.float32)
    z = z + fcb_ref[...]
    mean = jnp.mean(z, axis=-1, keepdims=True)
    var = jnp.mean(jnp.square(z - mean), axis=-1, keepdims=True)
    feat = (z - mean) * jax.lax.rsqrt(var + 1e-5)             # torch LN eps
    feat = feat * g_ref[...] + beta_ref[...]

    # trunk: Linear -> ReLU -> Linear -> ReLU -> Linear (mu | log_std)
    h1 = jnp.dot(feat.astype(w1_ref.dtype), w1_ref[...],
                 preferred_element_type=jnp.float32)
    h1 = jnp.maximum(h1 + b1_ref[...], 0.0)
    h2 = jnp.dot(h1.astype(w2_ref.dtype), w2_ref[...],
                 preferred_element_type=jnp.float32)
    h2 = jnp.maximum(h2 + b2_ref[...], 0.0)
    out = jnp.dot(h2.astype(w3_ref.dtype), w3_ref[...],
                  preferred_element_type=jnp.float32) + b3_ref[...]
    mu = out[:, :A]                                           # chunk(2, dim=-1)
    log_std = out[:, A:2 * A]

    log_std = jnp.tanh(log_std)
    log_std = log_std_min + 0.5 * (log_std_max - log_std_min) * (log_std + 1.0)
    std = jnp.exp(log_std)

    noise = noise_ref[...]
    pi = mu + noise * std

    # gaussian_logprob(noise, log_std)
    log_pi = jnp.sum(-0.5 * jnp.square(noise) - log_std, axis=-1, keepdims=True)
    log_pi = log_pi - 0.5 * np.log(2.0 * np.pi) * A

    # squash(mu, pi, log_pi)
    mu_t = jnp.tanh(mu)
    pi_t = jnp.tanh(pi)
    log_pi = log_pi - jnp.sum(
        jnp.log(jnp.maximum(1.0 - jnp.square(pi_t), 0.0) + 1e-6),
        axis=-1, keepdims=True)

    # single lane-dense packed output: [mu | pi | log_std | log_pi | 0...]
    o_ref[...] = jnp.zeros_like(o_ref)
    o_ref[:, 0:A] = mu_t.astype(o_ref.dtype)
    o_ref[:, A:2 * A] = pi_t.astype(o_ref.dtype)
    o_ref[:, 2 * A:3 * A] = log_std.astype(o_ref.dtype)
    o_ref[:, 3 * A:3 * A + 1] = log_pi.astype(o_ref.dtype)


def encoder_trunk_head(h, prep, noise, *, log_std_min, log_std_max):
    B, Fdim = h.shape
    D = prep["fc_w"].shape[1]
    Hd = prep["w1"].shape[1]
    A = noise.shape[1]
    OUT_W = _round_up(3 * A + 1, 128)
    TB = min(64, B)
    Bp = _round_up(B, TB)
    if Bp != B:
        h = jnp.pad(h, ((0, Bp - B), (0, 0)))
        noise = jnp.pad(noise, ((0, Bp - B), (0, 0)))
    packed = pl.pallas_call(
        functools.partial(_encoder_trunk_head_kernel, action_dim=A,
                          log_std_min=float(log_std_min),
                          log_std_max=float(log_std_max)),
        out_shape=jax.ShapeDtypeStruct((Bp, OUT_W), jnp.float32),
        grid=(Bp // TB,),
        in_specs=[pl.BlockSpec((TB, Fdim), lambda i: (i, 0)),
                  _const_spec((Fdim, D)), _const_spec((1, D)),
                  _const_spec((1, D)), _const_spec((1, D)),
                  _const_spec((D, Hd)), _const_spec((1, Hd)),
                  _const_spec((Hd, Hd)), _const_spec((1, Hd)),
                  _const_spec((Hd, 2 * A)), _const_spec((1, 2 * A)),
                  pl.BlockSpec((TB, A), lambda i: (i, 0))],
        out_specs=pl.BlockSpec((TB, OUT_W), lambda i: (i, 0)),
        compiler_params=pltpu.CompilerParams(
            dimension_semantics=("parallel",),
            vmem_limit_bytes=VMEM_LIMIT),
    )(h, prep["fc_w"], prep["fc_b"].reshape(1, D),
      prep["ln_g"].reshape(1, D), prep["ln_b"].reshape(1, D),
      prep["w1"], prep["b1"].reshape(1, Hd),
      prep["w2"], prep["b2"].reshape(1, Hd),
      prep["w3"], prep["b3"].reshape(1, 2 * A),
      noise)
    packed = packed[:B]
    mu = packed[:, :A]
    pi = packed[:, A:2 * A]
    log_std = packed[:, 2 * A:3 * A]
    log_pi = packed[:, 3 * A:3 * A + 1]
    return mu, pi, log_pi, log_std


# ------------------------------------------------------------------
# JAX glue: im2col (first conv only), geometry, parameter prep, forward
# ------------------------------------------------------------------

def im2col(x_nhwc, ksize, stride):
    B, H, W, C = x_nhwc.shape
    Ho = (H - ksize) // stride + 1
    Wo = (W - ksize) // stride + 1
    cols = []
    for kh in range(ksize):
        for kw in range(ksize):
            cols.append(x_nhwc[:, kh:kh + stride * (Ho - 1) + 1:stride,
                                  kw:kw + stride * (Wo - 1) + 1:stride, :])
    p = jnp.stack(cols, axis=3)                      # (B, Ho, Wo, K*K, C)
    return p.reshape(B * Ho * Wo, ksize * ksize * C), Ho, Wo


def conv_geometry(obs_shape, num_layers):
    C, H, W = obs_shape
    H1 = (H - 3) // 2 + 1
    W1 = (W - 3) // 2 + 1
    Hv, Wv = H1, W1
    for _ in range(num_layers - 1):
        Hv -= 2
        Wv -= 2
    return dict(pitch=W1, rows=H1 * W1, Hv=Hv, Wv=Wv)


def init_params(key, obs_shape, action_dim, hidden_dim,
                encoder_feature_dim, num_layers, num_filters):
    C, H, W = obs_shape
    keys = jax.random.split(key, 8 + num_layers)
    ortho = jax.nn.initializers.orthogonal()

    convs = []
    in_c = C
    for i in range(num_layers):
        w = jax.random.normal(keys[i], (num_filters, in_c, 3, 3), jnp.float32) * 0.1
        b = jnp.zeros((num_filters,), jnp.float32)
        convs.append((w, b))
        in_c = num_filters

    out = (H - 3) // 2 + 1
    for _ in range(num_layers - 1):
        out = out - 2
    flat = num_filters * out * out

    return {
        "convs": convs,
        "fc_w": ortho(keys[num_layers + 0], (flat, encoder_feature_dim), jnp.float32),
        "fc_b": jnp.zeros((encoder_feature_dim,), jnp.float32),
        "ln_g": jnp.ones((encoder_feature_dim,), jnp.float32),
        "ln_b": jnp.zeros((encoder_feature_dim,), jnp.float32),
        "w1": ortho(keys[num_layers + 1], (encoder_feature_dim, hidden_dim), jnp.float32),
        "b1": jnp.zeros((hidden_dim,), jnp.float32),
        "w2": ortho(keys[num_layers + 2], (hidden_dim, hidden_dim), jnp.float32),
        "b2": jnp.zeros((hidden_dim,), jnp.float32),
        "w3": ortho(keys[num_layers + 3], (hidden_dim, 2 * action_dim), jnp.float32),
        "b3": jnp.zeros((2 * action_dim,), jnp.float32),
    }


def prepare_params(params, obs_shape, num_layers):
    """One-time weight transforms: fold /255, flatten conv weights, remap the
    encoder fc weight to consume the NHWC pitch-P 'wide' flatten directly, and
    cast matmul operands to bf16."""
    geom = conv_geometry(obs_shape, num_layers)
    P, R, Hv, Wv = geom["pitch"], geom["rows"], geom["Hv"], geom["Wv"]

    prep = {}
    # conv1 (stride 2): (F,Cin,3,3) -> (9*Cin, F), /255 folded, K padded to 8.
    w0, b0 = params["convs"][0]
    F0 = w0.shape[0]
    wf = jnp.transpose(w0, (2, 3, 1, 0)).reshape(-1, F0) / 255.0
    K0 = wf.shape[0]
    K0p = _round_up(K0, 8)
    wf = jnp.pad(wf, ((0, K0p - K0), (0, 0)))
    prep["conv1_w"] = wf.astype(MATMUL_DTYPE)
    prep["conv1_b"] = b0.astype(jnp.float32)

    # stride-1 convs: (F,Cin,3,3) -> (9, Cin, F)
    prep["convs_s1"] = [
        (jnp.transpose(w, (2, 3, 1, 0)).reshape(9, w.shape[1], w.shape[0])
             .astype(MATMUL_DTYPE),
         b.astype(jnp.float32))
        for w, b in params["convs"][1:]
    ]

    # encoder fc weight: scatter its NCHW-ordered rows into the wide NHWC
    # positions (zero rows at invalid border positions) -> no transpose /
    # compaction pass over the activation at run time.
    D = params["fc_w"].shape[1]
    ii, jj, cc = np.meshgrid(np.arange(Hv), np.arange(Wv), np.arange(F0),
                             indexing="ij")
    wide_idx = ((ii * P + jj) * F0 + cc).reshape(-1)
    nchw_idx = (cc * (Hv * Wv) + ii * Wv + jj).reshape(-1)
    fcw = jnp.zeros((R * F0, D), jnp.float32)
    fcw = fcw.at[wide_idx].set(params["fc_w"][nchw_idx])
    prep["fc_w"] = fcw.astype(MATMUL_DTYPE)
    prep["fc_b"] = params["fc_b"].astype(jnp.float32)
    prep["ln_g"] = params["ln_g"].astype(jnp.float32)
    prep["ln_b"] = params["ln_b"].astype(jnp.float32)
    for k in ("w1", "w2", "w3"):
        prep[k] = params[k].astype(MATMUL_DTYPE)
    for k in ("b1", "b2", "b3"):
        prep[k] = params[k].astype(jnp.float32)
    return prep, geom


def actor_forward(prep, obs, noise, *, geom, log_std_min, log_std_max):
    """obs: (B, C, H, W) float32; noise: (B, A) standard normal."""
    B = obs.shape[0]
    P, R = geom["pitch"], geom["rows"]
    F0 = prep["conv1_w"].shape[1]

    # ----- encoder conv stack -----
    x = jnp.transpose(obs, (0, 2, 3, 1))             # NCHW -> NHWC (no /255)
    patches, _, _ = im2col(x, 3, 2)                  # (B*H1*W1, 9*Cin)
    kpad = prep["conv1_w"].shape[0] - patches.shape[1]
    if kpad:
        patches = jnp.pad(patches, ((0, 0), (0, kpad)))
    patches = patches.astype(MATMUL_DTYPE)
    y = matmul_bias_relu(patches, prep["conv1_w"], prep["conv1_b"])
    act = y.reshape(B, R, F0)                        # pitch-P flattened image

    for wt, bt in prep["convs_s1"]:
        act = conv3x3_s1_wide(act, wt, bt, pitch=P)  # in-kernel patches

    # ----- fused encoder-fc + LayerNorm + trunk + head -----
    hflat = act.reshape(B, R * F0)                   # free reshape, NHWC-wide
    return encoder_trunk_head(hflat, prep, noise,
                              log_std_min=log_std_min, log_std_max=log_std_max)


# ------------------------------------------------------------------
# Pure-JAX reference (mirrors the kernels' bf16 matmul rounding) for checking
# ------------------------------------------------------------------

def reference_forward(params, obs, noise, *, log_std_min, log_std_max):
    bf = MATMUL_DTYPE
    B = obs.shape[0]
    x = jnp.transpose(obs, (0, 2, 3, 1)).astype(bf)
    for i, (w, b) in enumerate(params["convs"]):
        stride = 2 if i == 0 else 1
        wt = jnp.transpose(w, (2, 3, 1, 0))
        if i == 0:
            wt = wt / 255.0
        y = jax.lax.conv_general_dilated(
            x, wt.astype(bf), (stride, stride), "VALID",
            dimension_numbers=("NHWC", "HWIO", "NHWC"),
            preferred_element_type=jnp.float32)
        x = jnp.maximum(y + b, 0.0).astype(bf)
    h = jnp.transpose(x, (0, 3, 1, 2)).reshape(B, -1)
    z = jnp.dot(h, params["fc_w"].astype(bf),
                preferred_element_type=jnp.float32) + params["fc_b"]
    mean = jnp.mean(z, -1, keepdims=True)
    var = jnp.mean(jnp.square(z - mean), -1, keepdims=True)
    feat = (z - mean) * jax.lax.rsqrt(var + 1e-5) * params["ln_g"] + params["ln_b"]
    h1 = jnp.maximum(jnp.dot(feat.astype(bf), params["w1"].astype(bf),
                             preferred_element_type=jnp.float32) + params["b1"], 0.0)
    h2 = jnp.maximum(jnp.dot(h1.astype(bf), params["w2"].astype(bf),
                             preferred_element_type=jnp.float32) + params["b2"], 0.0)
    out = jnp.dot(h2.astype(bf), params["w3"].astype(bf),
                  preferred_element_type=jnp.float32) + params["b3"]
    A = noise.shape[1]
    mu, log_std = out[:, :A], out[:, A:]
    log_std = jnp.tanh(log_std)
    log_std = log_std_min + 0.5 * (log_std_max - log_std_min) * (log_std + 1.0)
    std = jnp.exp(log_std)
    pi = mu + noise * std
    log_pi = jnp.sum(-0.5 * jnp.square(noise) - log_std, -1, keepdims=True)
    log_pi = log_pi - 0.5 * np.log(2.0 * np.pi) * A
    mu = jnp.tanh(mu)
    pi = jnp.tanh(pi)
    log_pi = log_pi - jnp.sum(
        jnp.log(jnp.maximum(1.0 - jnp.square(pi), 0.0) + 1e-6), -1, keepdims=True)
    return mu, pi, log_pi, log_std


# ------------------------------------------------------------------

if __name__ == "__main__":
    obs_shape = (4, 16, 16)       # (C, H, W)
    action_dim = 4
    hidden_dim = 32
    encoder_feature_dim = 32
    num_layers = 2
    num_filters = 8
    log_std_min, log_std_max = -10.0, 2.0
    B = 2

    key = jax.random.PRNGKey(0)
    k_param, k_obs, k_noise = jax.random.split(key, 3)
    params = init_params(k_param, obs_shape, action_dim, hidden_dim,
                         encoder_feature_dim, num_layers, num_filters)
    obs = jax.random.uniform(k_obs, (B,) + obs_shape, jnp.float32, 0.0, 255.0)
    noise = jax.random.normal(k_noise, (B, action_dim), jnp.float32)

    prep, geom = prepare_params(params, obs_shape, num_layers)

    fwd = jax.jit(functools.partial(actor_forward, geom=geom,
                                    log_std_min=log_std_min,
                                    log_std_max=log_std_max))
    mu, pi, log_pi, log_std = fwd(prep, obs, noise)
    jax.block_until_ready((mu, pi, log_pi, log_std))

    assert mu.shape == (B, action_dim) and pi.shape == (B, action_dim)
    assert log_pi.shape == (B, 1) and log_std.shape == (B, action_dim)

    # numerical cross-check against the plain-JAX reference
    rmu, rpi, rlogpi, rlogstd = reference_forward(
        params, obs, noise, log_std_min=log_std_min, log_std_max=log_std_max)
    assert float(jnp.max(jnp.abs(mu - rmu))) < 5e-2
    assert float(jnp.max(jnp.abs(pi - rpi))) < 5e-2
    assert float(jnp.max(jnp.abs(log_std - rlogstd))) < 5e-2
    assert float(jnp.max(jnp.abs(log_pi - rlogpi))) < 5e-1

    print("KERNEL_OK")
</pallas_src>

<mosaic_0001>
module attributes {stable_mosaic.version = 11 : i64} {
  func.func @_matmul_bias_relu_kernel(%arg0: i32, %arg1: memref<112x40xbf16, #tpu.memory_space<vmem>>, %arg2: memref<40x8xbf16, #tpu.memory_space<vmem>>, %arg3: memref<1x8xf32, #tpu.memory_space<vmem>>, %arg4: memref<112x8xbf16, #tpu.memory_space<vmem>>) attributes {dimension_semantics = [#tpu.dimension_semantics<parallel>], iteration_bounds = array<i64: 1>, scalar_prefetch = 0 : i64, scratch_operands = 0 : i64, tpu.core_type = #tpu.core_type<tc>, window_params = [{transform_indices = @transform_0, window_bounds = array<i64: 112, 40>}, {pipeline_mode = #tpu.pipeline_mode<synchronous>, transform_indices = @transform_1, window_bounds = array<i64: 40, 8>}, {pipeline_mode = #tpu.pipeline_mode<synchronous>, transform_indices = @transform_2, window_bounds = array<i64: 1, 8>}, {transform_indices = @transform_3, window_bounds = array<i64: 112, 8>}]} {
    %c0 = arith.constant 0 : index
    %c0_0 = arith.constant 0 : index
    %0 = vector.load %arg1[%c0, %c0_0] : memref<112x40xbf16, #tpu.memory_space<vmem>>, vector<112x40xbf16>
    %c0_1 = arith.constant 0 : index
    %c0_2 = arith.constant 0 : index
    %1 = vector.load %arg2[%c0_1, %c0_2] : memref<40x8xbf16, #tpu.memory_space<vmem>>, vector<40x8xbf16>
    %cst = arith.constant dense<0.000000e+00> : vector<112x8xf32>
    %2 = tpu.matmul %0, %1, %cst {dimension_numbers = #tpu.dot_dimension_numbers<[1], [0], [0], [1], [0, 0, 1, 1], [], []>} : vector<112x40xbf16>, vector<40x8xbf16>, vector<112x8xf32> -> vector<112x8xf32>
    %c0_3 = arith.constant 0 : index
    %c0_4 = arith.constant 0 : index
    %3 = vector.load %arg3[%c0_3, %c0_4] : memref<1x8xf32, #tpu.memory_space<vmem>>, vector<1x8xf32>
    %4 = vector.broadcast %3 : vector<1x8xf32> to vector<112x8xf32>
    %5 = arith.addf %2, %4 : vector<112x8xf32>
    %cst_5 = arith.constant 0.000000e+00 : f32
    %6 = vector.broadcast %cst_5 : f32 to vector<112x8xf32>
    %7 = arith.maximumf %5, %6 : vector<112x8xf32>
    %8 = arith.truncf %7 : vector<112x8xf32> to vector<112x8xbf16>
    %c0_6 = arith.constant 0 : index
    %c0_7 = arith.constant 0 : index
    %9 = vector.load %arg4[%c0_6, %c0_7] : memref<112x8xbf16, #tpu.memory_space<vmem>>, vector<112x8xbf16>
    tpu.vector_store %arg4[%c0_6, %c0_7], %8 {strides = array<i32>} : memref<112x8xbf16, #tpu.memory_space<vmem>>, vector<112x8xbf16>,
    return
  }
  func.func @transform_0(%arg0: i32) -> (i32, i32) {
    %c0_i32 = arith.constant 0 : i32
    %c0_i32_0 = arith.constant 0 : i32
    return %arg0, %c0_i32 : i32, i32
  }
  func.func @transform_1(%arg0: i32) -> (i32, i32) {
    %c0_i32 = arith.constant 0 : i32
    %c0_i32_0 = arith.constant 0 : i32
    %c0_i32_1 = arith.constant 0 : i32
    return %c0_i32, %c0_i32_0 : i32, i32
  }
  func.func @transform_2(%arg0: i32) -> (i32, i32) {
    %c0_i32 = arith.constant 0 : i32
    %c0_i32_0 = arith.constant 0 : i32
    %c0_i32_1 = arith.constant 0 : i32
    return %c0_i32, %c0_i32_0 : i32, i32
  }
  func.func @transform_3(%arg0: i32) -> (i32, i32) {
    %c0_i32 = arith.constant 0 : i32
    %c0_i32_0 = arith.constant 0 : i32
    return %arg0, %c0_i32 : i32, i32
  }
}

module attributes {stable_mosaic.version = 11 : i64} {
  func.func @_conv3x3_s1_wide_kernel(%arg0: i32, %arg1: memref<2x49x8xbf16, #tpu.memory_space<vmem>>, %arg2: memref<9x8x8xbf16, #tpu.memory_space<vmem>>, %arg3: memref<1x8xf32, #tpu.memory_space<vmem>>, %arg4: memref<2x49x8xbf16, #tpu.memory_space<vmem>>) attributes {dimension_semantics = [#tpu.dimension_semantics<parallel>], iteration_bounds = array<i64: 1>, scalar_prefetch = 0 : i64, scratch_operands = 0 : i64, tpu.core_type = #tpu.core_type<tc>, window_params = [{transform_indices = @transform_0, window_bounds = array<i64: 2, 49, 8>}, {pipeline_mode = #tpu.pipeline_mode<synchronous>, transform_indices = @transform_1, window_bounds = array<i64: 9, 8, 8>}, {pipeline_mode = #tpu.pipeline_mode<synchronous>, transform_indices = @transform_2, window_bounds = array<i64: 1, 8>}, {transform_indices = @transform_3, window_bounds = array<i64: 2, 49, 8>}]} {
    %cst = arith.constant 0.000000e+00 : f32
    %0 = vector.broadcast %cst : f32 to vector<33x8xf32>
    %c0 = arith.constant 0 : index
    %c0_0 = arith.constant 0 : index
    %c0_1 = arith.constant 0 : index
    %1 = vector.load %arg1[%c0, %c0_0, %c0_1] : memref<2x49x8xbf16, #tpu.memory_space<vmem>>, vector<1x33x8xbf16>
    %2 = vector.shape_cast %1 : vector<1x33x8xbf16> to vector<33x8xbf16>
    %c0_2 = arith.constant 0 : index
    %c0_3 = arith.constant 0 : index
    %c0_4 = arith.constant 0 : index
    %3 = vector.load %arg2[%c0_2, %c0_3, %c0_4] : memref<9x8x8xbf16, #tpu.memory_space<vmem>>, vector<1x8x8xbf16>
    %4 = vector.shape_cast %3 : vector<1x8x8xbf16> to vector<8x8xbf16>
    %cst_5 = arith.constant dense<0.000000e+00> : vector<33x8xf32>
    %5 = tpu.matmul %2, %4, %cst_5 {dimension_numbers = #tpu.dot_dimension_numbers<[1], [0], [0], [1], [0, 0, 1, 1], [], []>} : vector<33x8xbf16>, vector<8x8xbf16>, vector<33x8xf32> -> vector<33x8xf32>
    %6 = arith.addf %0, %5 : vector<33x8xf32>
    %c0_6 = arith.constant 0 : index
    %c1 = arith.constant 1 : index
    %c0_7 = arith.constant 0 : index
    %7 = vector.load %arg1[%c0_6, %c1, %c0_7] : memref<2x49x8xbf16, #tpu.memory_space<vmem>>, vector<1x33x8xbf16>
    %8 = vector.shape_cast %7 : vector<1x33x8xbf16> to vector<33x8xbf16>
    %c1_8 = arith.constant 1 : index
    %c0_9 = arith.constant 0 : index
    %c0_10 = arith.constant 0 : index
    %9 = vector.load %arg2[%c1_8, %c0_9, %c0_10] : memref<9x8x8xbf16, #tpu.memory_space<vmem>>, vector<1x8x8xbf16>
    %10 = vector.shape_cast %9 : vector<1x8x8xbf16> to vector<8x8xbf16>
    %cst_11 = arith.constant dense<0.000000e+00> : vector<33x8xf32>
    %11 = tpu.matmul %8, %10, %cst_11 {dimension_numbers = #tpu.dot_dimension_numbers<[1], [0], [0], [1], [0, 0, 1, 1], [], []>} : vector<33x8xbf16>, vector<8x8xbf16>, vector<33x8xf32> -> vector<33x8xf32>
    %12 = arith.addf %6, %11 : vector<33x8xf32>
    %c0_12 = arith.constant 0 : index
    %c2 = arith.constant 2 : index
    %c0_13 = arith.constant 0 : index
    %13 = vector.load %arg1[%c0_12, %c2, %c0_13] : memref<2x49x8xbf16, #tpu.memory_space<vmem>>, vector<1x33x8xbf16>
    %14 = vector.shape_cast %13 : vector<1x33x8xbf16> to vector<33x8xbf16>
    %c2_14 = arith.constant 2 : index
    %c0_15 = arith.constant 0 : index
    %c0_16 = arith.constant 0 : index
    %15 = vector.load %arg2[%c2_14, %c0_15, %c0_16] : memref<9x8x8xbf16, #tpu.memory_space<vmem>>, vector<1x8x8xbf16>
    %16 = vector.shape_cast %15 : vector<1x8x8xbf16> to vector<8x8xbf16>
    %cst_17 = arith.constant dense<0.000000e+00> : vector<33x8xf32>
    %17 = tpu.matmul %14, %16, %cst_17 {dimension_numbers = #tpu.dot_dimension_numbers<[1], [0], [0], [1], [0, 0, 1, 1], [], []>} : vector<33x8xbf16>, vector<8x8xbf16>, vector<33x8xf32> -> vector<33x8xf32>
    %18 = arith.addf %12, %17 : vector<33x8xf32>
    %c0_18 = arith.constant 0 : index
    %c7 = arith.constant 7 : index
    %c0_19 = arith.constant 0 : index
    %19 = vector.load %arg1[%c0_18, %c7, %c0_19] : memref<2x49x8xbf16, #tpu.memory_space<vmem>>, vector<1x33x8xbf16>
    %20 = vector.shape_cast %19 : vector<1x33x8xbf16> to vector<33x8xbf16>
    %c3 = arith.constant 3 : index
    %c0_20 = arith.constant 0 : index
    %c0_21 = arith.constant 0 : index
    %21 = vector.load %arg2[%c3, %c0_20, %c0_21] : memref<9x8x8xbf16, #tpu.memory_space<vmem>>, vector<1x8x8xbf16>
    %22 = vector.shape_cast %21 : vector<1x8x8xbf16> to vector<8x8xbf16>
    %cst_22 = arith.constant dense<0.000000e+00> : vector<33x8xf32>
    %23 = tpu.matmul %20, %22, %cst_22 {dimension_numbers = #tpu.dot_dimension_numbers<[1], [0], [0], [1], [0, 0, 1, 1], [], []>} : vector<33x8xbf16>, vector<8x8xbf16>, vector<33x8xf32> -> vector<33x8xf32>
    %24 = arith.addf %18, %23 : vector<33x8xf32>
    %c0_23 = arith.constant 0 : index
    %c8 = arith.constant 8 : index
    %c0_24 = arith.constant 0 : index
    %25 = vector.load %arg1[%c0_23, %c8, %c0_24] : memref<2x49x8xbf16, #tpu.memory_space<vmem>>, vector<1x33x8xbf16>
    %26 = vector.shape_cast %25 : vector<1x33x8xbf16> to vector<33x8xbf16>
    %c4 = arith.constant 4 : index
    %c0_25 = arith.constant 0 : index
    %c0_26 = arith.constant 0 : index
    %27 = vector.load %arg2[%c4, %c0_25, %c0_26] : memref<9x8x8xbf16, #tpu.memory_space<vmem>>, vector<1x8x8xbf16>
    %28 = vector.shape_cast %27 : vector<1x8x8xbf16> to vector<8x8xbf16>
    %cst_27 = arith.constant dense<0.000000e+00> : vector<33x8xf32>
    %29 = tpu.matmul %26, %28, %cst_27 {dimension_numbers = #tpu.dot_dimension_numbers<[1], [0], [0], [1], [0, 0, 1, 1], [], []>} : vector<33x8xbf16>, vector<8x8xbf16>, vector<33x8xf32> -> vector<33x8xf32>
    %30 = arith.addf %24, %29 : vector<33x8xf32>
    %c0_28 = arith.constant 0 : index
    %c9 = arith.constant 9 : index
    %c0_29 = arith.constant 0 : index
    %31 = vector.load %arg1[%c0_28, %c9, %c0_29] : memref<2x49x8xbf16, #tpu.memory_space<vmem>>, vector<1x33x8xbf16>
    %32 = vector.shape_cast %31 : vector<1x33x8xbf16> to vector<33x8xbf16>
    %c5 = arith.constant 5 : index
    %c0_30 = arith.constant 0 : index
    %c0_31 = arith.constant 0 : index
    %33 = vector.load %arg2[%c5, %c0_30, %c0_31] : memref<9x8x8xbf16, #tpu.memory_space<vmem>>, vector<1x8x8xbf16>
    %34 = vector.shape_cast %33 : vector<1x8x8xbf16> to vector<8x8xbf16>
    %cst_32 = arith.constant dense<0.000000e+00> : vector<33x8xf32>
    %35 = tpu.matmul %32, %34, %cst_32 {dimension_numbers = #tpu.dot_dimension_numbers<[1], [0], [0], [1], [0, 0, 1, 1], [], []>} : vector<33x8xbf16>, vector<8x8xbf16>, vector<33x8xf32> -> vector<33x8xf32>
    %36 = arith.addf %30, %35 : vector<33x8xf32>
    %c0_33 = arith.constant 0 : index
    %c14 = arith.constant 14 : index
    %c0_34 = arith.constant 0 : index
    %37 = vector.load %arg1[%c0_33, %c14, %c0_34] : memref<2x49x8xbf16, #tpu.memory_space<vmem>>, vector<1x33x8xbf16>
    %38 = vector.shape_cast %37 : vector<1x33x8xbf16> to vector<33x8xbf16>
    %c6 = arith.constant 6 : index
    %c0_35 = arith.constant 0 : index
    %c0_36 = arith.constant 0 : index
    %39 = vector.load %arg2[%c6, %c0_35, %c0_36] : memref<9x8x8xbf16, #tpu.memory_space<vmem>>, vector<1x8x8xbf16>
    %40 = vector.shape_cast %39 : vector<1x8x8xbf16> to vector<8x8xbf16>
    %cst_37 = arith.constant dense<0.000000e+00> : vector<33x8xf32>
    %41 = tpu.matmul %38, %40, %cst_37 {dimension_numbers = #tpu.dot_dimension_numbers<[1], [0], [0], [1], [0, 0, 1, 1], [], []>} : vector<33x8xbf16>, vector<8x8xbf16>, vector<33x8xf32> -> vector<33x8xf32>
    %42 = arith.addf %36, %41 : vector<33x8xf32>
    %c0_38 = arith.constant 0 : index
    %c15 = arith.constant 15 : index
    %c0_39 = arith.constant 0 : index
    %43 = vector.load %arg1[%c0_38, %c15, %c0_39] : memref<2x49x8xbf16, #tpu.memory_space<vmem>>, vector<1x33x8xbf16>
    %44 = vector.shape_cast %43 : vector<1x33x8xbf16> to vector<33x8xbf16>
    %c7_40 = arith.constant 7 : index
    %c0_41 = arith.constant 0 : index
    %c0_42 = arith.constant 0 : index
    %45 = vector.load %arg2[%c7_40, %c0_41, %c0_42] : memref<9x8x8xbf16, #tpu.memory_space<vmem>>, vector<1x8x8xbf16>
    %46 = vector.shape_cast %45 : vector<1x8x8xbf16> to vector<8x8xbf16>
    %cst_43 = arith.constant dense<0.000000e+00> : vector<33x8xf32>
    %47 = tpu.matmul %44, %46, %cst_43 {dimension_numbers = #tpu.dot_dimension_numbers<[1], [0], [0], [1], [0, 0, 1, 1], [], []>} : vector<33x8xbf16>, vector<8x8xbf16>, vector<33x8xf32> -> vector<33x8xf32>
    %48 = arith.addf %42, %47 : vector<33x8xf32>
    %c0_44 = arith.constant 0 : index
    %c16 = arith.constant 16 : index
    %c0_45 = arith.constant 0 : index
    %49 = vector.load %arg1[%c0_44, %c16, %c0_45] : memref<2x49x8xbf16, #tpu.memory_space<vmem>>, vector<1x33x8xbf16>
    %50 = vector.shape_cast %49 : vector<1x33x8xbf16> to vector<33x8xbf16>
    %c8_46 = arith.constant 8 : index
    %c0_47 = arith.constant 0 : index
    %c0_48 = arith.constant 0 : index
    %51 = vector.load %arg2[%c8_46, %c0_47, %c0_48] : memref<9x8x8xbf16, #tpu.memory_space<vmem>>, vector<1x8x8xbf16>
    %52 = vector.shape_cast %51 : vector<1x8x8xbf16> to vector<8x8xbf16>
    %cst_49 = arith.constant dense<0.000000e+00> : vector<33x8xf32>
    %53 = tpu.matmul %50, %52, %cst_49 {dimension_numbers = #tpu.dot_dimension_numbers<[1], [0], [0], [1], [0, 0, 1, 1], [], []>} : vector<33x8xbf16>, vector<8x8xbf16>, vector<33x8xf32> -> vector<33x8xf32>
    %54 = arith.addf %48, %53 : vector<33x8xf32>
    %c0_50 = arith.constant 0 : index
    %c0_51 = arith.constant 0 : index
    %55 = vector.load %arg3[%c0_50, %c0_51] : memref<1x8xf32, #tpu.memory_space<vmem>>, vector<1x8xf32>
    %56 = vector.broadcast %55 : vector<1x8xf32> to vector<33x8xf32>
    %57 = arith.addf %54, %56 : vector<33x8xf32>
    %cst_52 = arith.constant 0.000000e+00 : f32
    %58 = vector.broadcast %cst_52 : f32 to vector<33x8xf32>
    %59 = arith.maximumf %57, %58 : vector<33x8xf32>
    %60 = arith.truncf %59 : vector<33x8xf32> to vector<33x8xbf16>
    %c0_53 = arith.constant 0 : index
    %c0_54 = arith.constant 0 : index
    %c0_55 = arith.constant 0 : index
    %61 = vector.load %arg4[%c0_53, %c0_54, %c0_55] : memref<2x49x8xbf16, #tpu.memory_space<vmem>>, vector<1x33x8xbf16>
    %62 = vector.shape_cast %61 : vector<1x33x8xbf16> to vector<33x8xbf16>
    %63 = vector.shape_cast %60 : vector<33x8xbf16> to vector<1x33x8xbf16>
    tpu.vector_store %arg4[%c0_53, %c0_54, %c0_55], %63 {strides = array<i32>} : memref<2x49x8xbf16, #tpu.memory_space<vmem>>, vector<1x33x8xbf16>,
    %cst_56 = arith.constant 0.000000e+00 : bf16
    %64 = vector.broadcast %cst_56 : bf16 to vector<16x8xbf16>
    %c0_57 = arith.constant 0 : index
    %c33 = arith.constant 33 : index
    %c0_58 = arith.constant 0 : index
    %65 = vector.load %arg4[%c0_57, %c33, %c0_58] : memref<2x49x8xbf16, #tpu.memory_space<vmem>>, vector<1x16x8xbf16>
    %66 = vector.shape_cast %65 : vector<1x16x8xbf16> to vector<16x8xbf16>
    %67 = vector.shape_cast %64 : vector<16x8xbf16> to vector<1x16x8xbf16>
    tpu.vector_store %arg4[%c0_57, %c33, %c0_58], %67 {strides = array<i32>} : memref<2x49x8xbf16, #tpu.memory_space<vmem>>, vector<1x16x8xbf16>,
    %cst_59 = arith.constant 0.000000e+00 : f32
    %68 = vector.broadcast %cst_59 : f32 to vector<33x8xf32>
    %c1_60 = arith.constant 1 : index
    %c0_61 = arith.constant 0 : index
    %c0_62 = arith.constant 0 : index
    %69 = vector.load %arg1[%c1_60, %c0_61, %c0_62] : memref<2x49x8xbf16, #tpu.memory_space<vmem>>, vector<1x33x8xbf16>
    %70 = vector.shape_cast %69 : vector<1x33x8xbf16> to vector<33x8xbf16>
    %c0_63 = arith.constant 0 : index
    %c0_64 = arith.constant 0 : index
    %c0_65 = arith.constant 0 : index
    %71 = vector.load %arg2[%c0_63, %c0_64, %c0_65] : memref<9x8x8xbf16, #tpu.memory_space<vmem>>, vector<1x8x8xbf16>
    %72 = vector.shape_cast %71 : vector<1x8x8xbf16> to vector<8x8xbf16>
    %cst_66 = arith.constant dense<0.000000e+00> : vector<33x8xf32>
    %73 = tpu.matmul %70, %72, %cst_66 {dimension_numbers = #tpu.dot_dimension_numbers<[1], [0], [0], [1], [0, 0, 1, 1], [], []>} : vector<33x8xbf16>, vector<8x8xbf16>, vector<33x8xf32> -> vector<33x8xf32>
    %74 = arith.addf %68, %73 : vector<33x8xf32>
    %c1_67 = arith.constant 1 : index
    %c1_68 = arith.constant 1 : index
    %c0_69 = arith.constant 0 : index
    %75 = vector.load %arg1[%c1_67, %c1_68, %c0_69] : memref<2x49x8xbf16, #tpu.memory_space<vmem>>, vector<1x33x8xbf16>
    %76 = vector.shape_cast %75 : vector<1x33x8xbf16> to vector<33x8xbf16>
    %c1_70 = arith.constant 1 : index
    %c0_71 = arith.constant 0 : index
    %c0_72 = arith.constant 0 : index
    %77 = vector.load %arg2[%c1_70, %c0_71, %c0_72] : memref<9x8x8xbf16, #tpu.memory_space<vmem>>, vector<1x8x8xbf16>
    %78 = vector.shape_cast %77 : vector<1x8x8xbf16> to vector<8x8xbf16>
    %cst_73 = arith.constant dense<0.000000e+00> : vector<33x8xf32>
    %79 = tpu.matmul %76, %78, %cst_73 {dimension_numbers = #tpu.dot_dimension_numbers<[1], [0], [0], [1], [0, 0, 1, 1], [], []>} : vector<33x8xbf16>, vector<8x8xbf16>, vector<33x8xf32> -> vector<33x8xf32>
    %80 = arith.addf %74, %79 : vector<33x8xf32>
    %c1_74 = arith.constant 1 : index
    %c2_75 = arith.constant 2 : index
    %c0_76 = arith.constant 0 : index
    %81 = vector.load %arg1[%c1_74, %c2_75, %c0_76] : memref<2x49x8xbf16, #tpu.memory_space<vmem>>, vector<1x33x8xbf16>
    %82 = vector.shape_cast %81 : vector<1x33x8xbf16> to vector<33x8xbf16>
    %c2_77 = arith.constant 2 : index
    %c0_78 = arith.constant 0 : index
    %c0_79 = arith.constant 0 : index
    %83 = vector.load %arg2[%c2_77, %c0_78, %c0_79] : memref<9x8x8xbf16, #tpu.memory_space<vmem>>, vector<1x8x8xbf16>
    %84 = vector.shape_cast %83 : vector<1x8x8xbf16> to vector<8x8xbf16>
    %cst_80 = arith.constant dense<0.000000e+00> : vector<33x8xf32>
    %85 = tpu.matmul %82, %84, %cst_80 {dimension_numbers = #tpu.dot_dimension_numbers<[1], [0], [0], [1], [0, 0, 1, 1], [], []>} : vector<33x8xbf16>, vector<8x8xbf16>, vector<33x8xf32> -> vector<33x8xf32>
    %86 = arith.addf %80, %85 : vector<33x8xf32>
    %c1_81 = arith.constant 1 : index
    %c7_82 = arith.constant 7 : index
    %c0_83 = arith.constant 0 : index
    %87 = vector.load %arg1[%c1_81, %c7_82, %c0_83] : memref<2x49x8xbf16, #tpu.memory_space<vmem>>, vector<1x33x8xbf16>
    %88 = vector.shape_cast %87 : vector<1x33x8xbf16> to vector<33x8xbf16>
    %c3_84 = arith.constant 3 : index
    %c0_85 = arith.constant 0 : index
    %c0_86 = arith.constant 0 : index
    %89 = vector.load %arg2[%c3_84, %c0_85, %c0_86] : memref<9x8x8xbf16, #tpu.memory_space<vmem>>, vector<1x8x8xbf16>
    %90 = vector.shape_cast %89 : vector<1x8x8xbf16> to vector<8x8xbf16>
    %cst_87 = arith.constant dense<0.000000e+00> : vector<33x8xf32>
    %91 = tpu.matmul %88, %90, %cst_87 {dimension_numbers = #tpu.dot_dimension_numbers<[1], [0], [0], [1], [0, 0, 1, 1], [], []>} : vector<33x8xbf16>, vector<8x8xbf16>, vector<33x8xf32> -> vector<33x8xf32>
    %92 = arith.addf %86, %91 : vector<33x8xf32>
    %c1_88 = arith.constant 1 : index
    %c8_89 = arith.constant 8 : index
    %c0_90 = arith.constant 0 : index
    %93 = vector.load %arg1[%c1_88, %c8_89, %c0_90] : memref<2x49x8xbf16, #tpu.memory_space<vmem>>, vector<1x33x8xbf16>
    %94 = vector.shape_cast %93 : vector<1x33x8xbf16> to vector<33x8xbf16>
    %c4_91 = arith.constant 4 : index
    %c0_92 = arith.constant 0 : index
    %c0_93 = arith.constant 0 : index
    %95 = vector.load %arg2[%c4_91, %c0_92, %c0_93] : memref<9x8x8xbf16, #tpu.memory_space<vmem>>, vector<1x8x8xbf16>
    %96 = vector.shape_cast %95 : vector<1x8x8xbf16> to vector<8x8xbf16>
    %cst_94 = arith.constant dense<0.000000e+00> : vector<33x8xf32>
    %97 = tpu.matmul %94, %96, %cst_94 {dimension_numbers = #tpu.dot_dimension_numbers<[1], [0], [0], [1], [0, 0, 1, 1], [], []>} : vector<33x8xbf16>, vector<8x8xbf16>, vector<33x8xf32> -> vector<33x8xf32>
    %98 = arith.addf %92, %97 : vector<33x8xf32>
    %c1_95 = arith.constant 1 : index
    %c9_96 = arith.constant 9 : index
    %c0_97 = arith.constant 0 : index
    %99 = vector.load %arg1[%c1_95, %c9_96, %c0_97] : memref<2x49x8xbf16, #tpu.memory_space<vmem>>, vector<1x33x8xbf16>
    %100 = vector.shape_cast %99 : vector<1x33x8xbf16> to vector<33x8xbf16>
    %c5_98 = arith.constant 5 : index
    %c0_99 = arith.constant 0 : index
    %c0_100 = arith.constant 0 : index
    %101 = vector.load %arg2[%c5_98, %c0_99, %c0_100] : memref<9x8x8xbf16, #tpu.memory_space<vmem>>, vector<1x8x8xbf16>
    %102 = vector.shape_cast %101 : vector<1x8x8xbf16> to vector<8x8xbf16>
    %cst_101 = arith.constant dense<0.000000e+00> : vector<33x8xf32>
    %103 = tpu.matmul %100, %102, %cst_101 {dimension_numbers = #tpu.dot_dimension_numbers<[1], [0], [0], [1], [0, 0, 1, 1], [], []>} : vector<33x8xbf16>, vector<8x8xbf16>, vector<33x8xf32> -> vector<33x8xf32>
    %104 = arith.addf %98, %103 : vector<33x8xf32>
    %c1_102 = arith.constant 1 : index
    %c14_103 = arith.constant 14 : index
    %c0_104 = arith.constant 0 : index
    %105 = vector.load %arg1[%c1_102, %c14_103, %c0_104] : memref<2x49x8xbf16, #tpu.memory_space<vmem>>, vector<1x33x8xbf16>
    %106 = vector.shape_cast %105 : vector<1x33x8xbf16> to vector<33x8xbf16>
    %c6_105 = arith.constant 6 : index
    %c0_106 = arith.constant 0 : index
    %c0_107 = arith.constant 0 : index
    %107 = vector.load %arg2[%c6_105, %c0_106, %c0_107] : memref<9x8x8xbf16, #tpu.memory_space<vmem>>, vector<1x8x8xbf16>
    %108 = vector.shape_cast %107 : vector<1x8x8xbf16> to vector<8x8xbf16>
    %cst_108 = arith.constant dense<0.000000e+00> : vector<33x8xf32>
    %109 = tpu.matmul %106, %108, %cst_108 {dimension_numbers = #tpu.dot_dimension_numbers<[1], [0], [0], [1], [0, 0, 1, 1], [], []>} : vector<33x8xbf16>, vector<8x8xbf16>, vector<33x8xf32> -> vector<33x8xf32>
    %110 = arith.addf %104, %109 : vector<33x8xf32>
    %c1_109 = arith.constant 1 : index
    %c15_110 = arith.constant 15 : index
    %c0_111 = arith.constant 0 : index
    %111 = vector.load %arg1[%c1_109, %c15_110, %c0_111] : memref<2x49x8xbf16, #tpu.memory_space<vmem>>, vector<1x33x8xbf16>
    %112 = vector.shape_cast %111 : vector<1x33x8xbf16> to vector<33x8xbf16>
    %c7_112 = arith.constant 7 : index
    %c0_113 = arith.constant 0 : index
    %c0_114 = arith.constant 0 : index
    %113 = vector.load %arg2[%c7_112, %c0_113, %c0_114] : memref<9x8x8xbf16, #tpu.memory_space<vmem>>, vector<1x8x8xbf16>
    %114 = vector.shape_cast %113 : vector<1x8x8xbf16> to vector<8x8xbf16>
    %cst_115 = arith.constant dense<0.000000e+00> : vector<33x8xf32>
    %115 = tpu.matmul %112, %114, %cst_115 {dimension_numbers = #tpu.dot_dimension_numbers<[1], [0], [0], [1], [0, 0, 1, 1], [], []>} : vector<33x8xbf16>, vector<8x8xbf16>, vector<33x8xf32> -> vector<33x8xf32>
    %116 = arith.addf %110, %115 : vector<33x8xf32>
    %c1_116 = arith.constant 1 : index
    %c16_117 = arith.constant 16 : index
    %c0_118 = arith.constant 0 : index
    %117 = vector.load %arg1[%c1_116, %c16_117, %c0_118] : memref<2x49x8xbf16, #tpu.memory_space<vmem>>, vector<1x33x8xbf16>
    %118 = vector.shape_cast %117 : vector<1x33x8xbf16> to vector<33x8xbf16>
    %c8_119 = arith.constant 8 : index
    %c0_120 = arith.constant 0 : index
    %c0_121 = arith.constant 0 : index
    %119 = vector.load %arg2[%c8_119, %c0_120, %c0_121] : memref<9x8x8xbf16, #tpu.memory_space<vmem>>, vector<1x8x8xbf16>
    %120 = vector.shape_cast %119 : vector<1x8x8xbf16> to vector<8x8xbf16>
    %cst_122 = arith.constant dense<0.000000e+00> : vector<33x8xf32>
    %121 = tpu.matmul %118, %120, %cst_122 {dimension_numbers = #tpu.dot_dimension_numbers<[1], [0], [0], [1], [0, 0, 1, 1], [], []>} : vector<33x8xbf16>, vector<8x8xbf16>, vector<33x8xf32> -> vector<33x8xf32>
    %122 = arith.addf %116, %121 : vector<33x8xf32>
    %c0_123 = arith.constant 0 : index
    %c0_124 = arith.constant 0 : index
    %123 = vector.load %arg3[%c0_123, %c0_124] : memref<1x8xf32, #tpu.memory_space<vmem>>, vector<1x8xf32>
    %124 = vector.broadcast %123 : vector<1x8xf32> to vector<33x8xf32>
    %125 = arith.addf %122, %124 : vector<33x8xf32>
    %cst_125 = arith.constant 0.000000e+00 : f32
    %126 = vector.broadcast %cst_125 : f32 to vector<33x8xf32>
    %127 = arith.maximumf %125, %126 : vector<33x8xf32>
    %128 = arith.truncf %127 : vector<33x8xf32> to vector<33x8xbf16>
    %c1_126 = arith.constant 1 : index
    %c0_127 = arith.constant 0 : index
    %c0_128 = arith.constant 0 : index
    %129 = vector.load %arg4[%c1_126, %c0_127, %c0_128] : memref<2x49x8xbf16, #tpu.memory_space<vmem>>, vector<1x33x8xbf16>
    %130 = vector.shape_cast %129 : vector<1x33x8xbf16> to vector<33x8xbf16>
    %131 = vector.shape_cast %128 : vector<33x8xbf16> to vector<1x33x8xbf16>
    tpu.vector_store %arg4[%c1_126, %c0_127, %c0_128], %131 {strides = array<i32>} : memref<2x49x8xbf16, #tpu.memory_space<vmem>>, vector<1x33x8xbf16>,
    %cst_129 = arith.constant 0.000000e+00 : bf16
    %132 = vector.broadcast %cst_129 : bf16 to vector<16x8xbf16>
    %c1_130 = arith.constant 1 : index
    %c33_131 = arith.constant 33 : index
    %c0_132 = arith.constant 0 : index
    %133 = vector.load %arg4[%c1_130, %c33_131, %c0_132] : memref<2x49x8xbf16, #tpu.memory_space<vmem>>, vector<1x16x8xbf16>
    %134 = vector.shape_cast %133 : vector<1x16x8xbf16> to vector<16x8xbf16>
    %135 = vector.shape_cast %132 : vector<16x8xbf16> to vector<1x16x8xbf16>
    tpu.vector_store %arg4[%c1_130, %c33_131, %c0_132], %135 {strides = array<i32>} : memref<2x49x8xbf16, #tpu.memory_space<vmem>>, vector<1x16x8xbf16>,
    return
  }
  func.func @transform_0(%arg0: i32) -> (i32, i32, i32) {
    %c0_i32 = arith.constant 0 : i32
    %c0_i32_0 = arith.constant 0 : i32
    %c0_i32_1 = arith.constant 0 : i32
    return %arg0, %c0_i32, %c0_i32_0 : i32, i32, i32
  }
  func.func @transform_1(%arg0: i32) -> (i32, i32, i32) {
    %c0_i32 = arith.constant 0 : i32
    %c0_i32_0 = arith.constant 0 : i32
    %c0_i32_1 = arith.constant 0 : i32
    %c0_i32_2 = arith.constant 0 : i32
    return %c0_i32, %c0_i32_0, %c0_i32_1 : i32, i32, i32
  }
  func.func @transform_2(%arg0: i32) -> (i32, i32) {
    %c0_i32 = arith.constant 0 : i32
    %c0_i32_0 = arith.constant 0 : i32
    %c0_i32_1 = arith.constant 0 : i32
    return %c0_i32, %c0_i32_0 : i32, i32
  }
  func.func @transform_3(%arg0: i32) -> (i32, i32, i32) {
    %c0_i32 = arith.constant 0 : i32
    %c0_i32_0 = arith.constant 0 : i32
    %c0_i32_1 = arith.constant 0 : i32
    return %arg0, %c0_i32, %c0_i32_0 : i32, i32, i32
  }
}

module attributes {stable_mosaic.version = 11 : i64} {
  func.func @_encoder_trunk_head_kernel(%arg0: i32, %arg1: memref<2x392xbf16, #tpu.memory_space<vmem>>, %arg2: memref<392x32xbf16, #tpu.memory_space<vmem>>, %arg3: memref<1x32xf32, #tpu.memory_space<vmem>>, %arg4: memref<1x32xf32, #tpu.memory_space<vmem>>, %arg5: memref<1x32xf32, #tpu.memory_space<vmem>>, %arg6: memref<32x32xbf16, #tpu.memory_space<vmem>>, %arg7: memref<1x32xf32, #tpu.memory_space<vmem>>, %arg8: memref<32x32xbf16, #tpu.memory_space<vmem>>, %arg9: memref<1x32xf32, #tpu.memory_space<vmem>>, %arg10: memref<32x8xbf16, #tpu.memory_space<vmem>>, %arg11: memref<1x8xf32, #tpu.memory_space<vmem>>, %arg12: memref<2x4xf32, #tpu.memory_space<vmem>>, %arg13: memref<2x128xf32, #tpu.memory_space<vmem>>) attributes {dimension_semantics = [#tpu.dimension_semantics<parallel>], iteration_bounds = array<i64: 1>, scalar_prefetch = 0 : i64, scratch_operands = 0 : i64, tpu.core_type = #tpu.core_type<tc>, window_params = [{transform_indices = @transform_0, window_bounds = array<i64: 2, 392>}, {pipeline_mode = #tpu.pipeline_mode<synchronous>, transform_indices = @transform_1, window_bounds = array<i64: 392, 32>}, {pipeline_mode = #tpu.pipeline_mode<synchronous>, transform_indices = @transform_2, window_bounds = array<i64: 1, 32>}, {pipeline_mode = #tpu.pipeline_mode<synchronous>, transform_indices = @transform_3, window_bounds = array<i64: 1, 32>}, {pipeline_mode = #tpu.pipeline_mode<synchronous>, transform_indices = @transform_4, window_bounds = array<i64: 1, 32>}, {pipeline_mode = #tpu.pipeline_mode<synchronous>, transform_indices = @transform_5, window_bounds = array<i64: 32, 32>}, {pipeline_mode = #tpu.pipeline_mode<synchronous>, transform_indices = @transform_6, window_bounds = array<i64: 1, 32>}, {pipeline_mode = #tpu.pipeline_mode<synchronous>, transform_indices = @transform_7, window_bounds = array<i64: 32, 32>}, {pipeline_mode = #tpu.pipeline_mode<synchronous>, transform_indices = @transform_8, window_bounds = array<i64: 1, 32>}, {pipeline_mode = #tpu.pipeline_mode<synchronous>, transform_indices = @transform_9, window_bounds = array<i64: 32, 8>}, {pipeline_mode = #tpu.pipeline_mode<synchronous>, transform_indices = @transform_10, window_bounds = array<i64: 1, 8>}, {transform_indices = @transform_11, window_bounds = array<i64: 2, 4>}, {transform_indices = @transform_12, window_bounds = array<i64: 2, 128>}]} {
    %c0 = arith.constant 0 : index
    %c0_0 = arith.constant 0 : index
    %0 = vector.load %arg1[%c0, %c0_0] : memref<2x392xbf16, #tpu.memory_space<vmem>>, vector<2x392xbf16>
    %c0_1 = arith.constant 0 : index
    %c0_2 = arith.constant 0 : index
    %1 = vector.load %arg2[%c0_1, %c0_2] : memref<392x32xbf16, #tpu.memory_space<vmem>>, vector<392x32xbf16>
    %cst = arith.constant dense<0.000000e+00> : vector<2x32xf32>
    %2 = tpu.matmul %0, %1, %cst {dimension_numbers = #tpu.dot_dimension_numbers<[1], [0], [0], [1], [0, 0, 1, 1], [], []>} : vector<2x392xbf16>, vector<392x32xbf16>, vector<2x32xf32> -> vector<2x32xf32>
    %c0_3 = arith.constant 0 : index
    %c0_4 = arith.constant 0 : index
    %3 = vector.load %arg3[%c0_3, %c0_4] : memref<1x32xf32, #tpu.memory_space<vmem>>, vector<1x32xf32>
    %4 = vector.broadcast %3 : vector<1x32xf32> to vector<2x32xf32>
    %5 = arith.addf %2, %4 : vector<2x32xf32>
    %cst_5 = arith.constant dense<0.000000e+00> : vector<2xf32>
    %6 = vector.multi_reduction <add>, %5, %cst_5 [1] : vector<2x32xf32> to vector<2xf32>
    %7 = vector.shape_cast %6 : vector<2xf32> to vector<2x1xf32>
    %cst_6 = arith.constant 3.200000e+01 : f32
    %8 = vector.broadcast %cst_6 : f32 to vector<2x1xf32>
    %9 = arith.divf %7, %8 : vector<2x1xf32>
    %10 = vector.broadcast %9 : vector<2x1xf32> to vector<2x32xf32>
    %11 = arith.subf %5, %10 : vector<2x32xf32>
    %12 = arith.mulf %11, %11 : vector<2x32xf32>
    %cst_7 = arith.constant dense<0.000000e+00> : vector<2xf32>
    %13 = vector.multi_reduction <add>, %12, %cst_7 [1] : vector<2x32xf32> to vector<2xf32>
    %14 = vector.shape_cast %13 : vector<2xf32> to vector<2x1xf32>
    %cst_8 = arith.constant 3.200000e+01 : f32
    %15 = vector.broadcast %cst_8 : f32 to vector<2x1xf32>
    %16 = arith.divf %14, %15 : vector<2x1xf32>
    %17 = vector.broadcast %9 : vector<2x1xf32> to vector<2x32xf32>
    %18 = arith.subf %5, %17 : vector<2x32xf32>
    %cst_9 = arith.constant 9.99999974E-6 : f32
    %19 = vector.broadcast %cst_9 : f32 to vector<2x1xf32>
    %20 = arith.addf %16, %19 : vector<2x1xf32>
    %21 = math.rsqrt %20 : vector<2x1xf32>
    %22 = vector.broadcast %21 : vector<2x1xf32> to vector<2x32xf32>
    %23 = arith.mulf %18, %22 : vector<2x32xf32>
    %c0_10 = arith.constant 0 : index
    %c0_11 = arith.constant 0 : index
    %24 = vector.load %arg4[%c0_10, %c0_11] : memref<1x32xf32, #tpu.memory_space<vmem>>, vector<1x32xf32>
    %25 = vector.broadcast %24 : vector<1x32xf32> to vector<2x32xf32>
    %26 = arith.mulf %23, %25 : vector<2x32xf32>
    %c0_12 = arith.constant 0 : index
    %c0_13 = arith.constant 0 : index
    %27 = vector.load %arg5[%c0_12, %c0_13] : memref<1x32xf32, #tpu.memory_space<vmem>>, vector<1x32xf32>
    %28 = vector.broadcast %27 : vector<1x32xf32> to vector<2x32xf32>
    %29 = arith.addf %26, %28 : vector<2x32xf32>
    %30 = arith.truncf %29 : vector<2x32xf32> to vector<2x32xbf16>
    %c0_14 = arith.constant 0 : index
    %c0_15 = arith.constant 0 : index
    %31 = vector.load %arg6[%c0_14, %c0_15] : memref<32x32xbf16, #tpu.memory_space<vmem>>, vector<32x32xbf16>
    %cst_16 = arith.constant dense<0.000000e+00> : vector<2x32xf32>
    %32 = tpu.matmul %30, %31, %cst_16 {dimension_numbers = #tpu.dot_dimension_numbers<[1], [0], [0], [1], [0, 0, 1, 1], [], []>} : vector<2x32xbf16>, vector<32x32xbf16>, vector<2x32xf32> -> vector<2x32xf32>
    %c0_17 = arith.constant 0 : index
    %c0_18 = arith.constant 0 : index
    %33 = vector.load %arg7[%c0_17, %c0_18] : memref<1x32xf32, #tpu.memory_space<vmem>>, vector<1x32xf32>
    %34 = vector.broadcast %33 : vector<1x32xf32> to vector<2x32xf32>
    %35 = arith.addf %32, %34 : vector<2x32xf32>
    %cst_19 = arith.constant 0.000000e+00 : f32
    %36 = vector.broadcast %cst_19 : f32 to vector<2x32xf32>
    %37 = arith.maximumf %35, %36 : vector<2x32xf32>
    %38 = arith.truncf %37 : vector<2x32xf32> to vector<2x32xbf16>
    %c0_20 = arith.constant 0 : index
    %c0_21 = arith.constant 0 : index
    %39 = vector.load %arg8[%c0_20, %c0_21] : memref<32x32xbf16, #tpu.memory_space<vmem>>, vector<32x32xbf16>
    %cst_22 = arith.constant dense<0.000000e+00> : vector<2x32xf32>
    %40 = tpu.matmul %38, %39, %cst_22 {dimension_numbers = #tpu.dot_dimension_numbers<[1], [0], [0], [1], [0, 0, 1, 1], [], []>} : vector<2x32xbf16>, vector<32x32xbf16>, vector<2x32xf32> -> vector<2x32xf32>
    %c0_23 = arith.constant 0 : index
    %c0_24 = arith.constant 0 : index
    %41 = vector.load %arg9[%c0_23, %c0_24] : memref<1x32xf32, #tpu.memory_space<vmem>>, vector<1x32xf32>
    %42 = vector.broadcast %41 : vector<1x32xf32> to vector<2x32xf32>
    %43 = arith.addf %40, %42 : vector<2x32xf32>
    %cst_25 = arith.constant 0.000000e+00 : f32
    %44 = vector.broadcast %cst_25 : f32 to vector<2x32xf32>
    %45 = arith.maximumf %43, %44 : vector<2x32xf32>
    %46 = arith.truncf %45 : vector<2x32xf32> to vector<2x32xbf16>
    %c0_26 = arith.constant 0 : index
    %c0_27 = arith.constant 0 : index
    %47 = vector.load %arg10[%c0_26, %c0_27] : memref<32x8xbf16, #tpu.memory_space<vmem>>, vector<32x8xbf16>
    %cst_28 = arith.constant dense<0.000000e+00> : vector<2x8xf32>
    %48 = tpu.matmul %46, %47, %cst_28 {dimension_numbers = #tpu.dot_dimension_numbers<[1], [0], [0], [1], [0, 0, 1, 1], [], []>} : vector<2x32xbf16>, vector<32x8xbf16>, vector<2x8xf32> -> vector<2x8xf32>
    %c0_29 = arith.constant 0 : index
    %c0_30 = arith.constant 0 : index
    %49 = vector.load %arg11[%c0_29, %c0_30] : memref<1x8xf32, #tpu.memory_space<vmem>>, vector<1x8xf32>
    %50 = vector.broadcast %49 : vector<1x8xf32> to vector<2x8xf32>
    %51 = arith.addf %48, %50 : vector<2x8xf32>
    %52 = vector.extract_strided_slice %51 {offsets = [0, 0], sizes = [2, 4], strides = [1, 1]} : vector<2x8xf32> to vector<2x4xf32>
    %53 = vector.extract_strided_slice %51 {offsets = [0, 4], sizes = [2, 4], strides = [1, 1]} : vector<2x8xf32> to vector<2x4xf32>
    %54 = math.tanh %53 : vector<2x4xf32>
    %cst_31 = arith.constant 1.000000e+00 : f32
    %55 = vector.broadcast %cst_31 : f32 to vector<2x4xf32>
    %56 = arith.addf %54, %55 : vector<2x4xf32>
    %cst_32 = arith.constant 6.000000e+00 : f32
    %57 = vector.broadcast %cst_32 : f32 to vector<2x4xf32>
    %58 = arith.mulf %57, %56 : vector<2x4xf32>
    %cst_33 = arith.constant -1.000000e+01 : f32
    %59 = vector.broadcast %cst_33 : f32 to vector<2x4xf32>
    %60 = arith.addf %59, %58 : vector<2x4xf32>
    %61 = math.exp %60 : vector<2x4xf32>
    %c0_34 = arith.constant 0 : index
    %c0_35 = arith.constant 0 : index
    %62 = vector.load %arg12[%c0_34, %c0_35] : memref<2x4xf32, #tpu.memory_space<vmem>>, vector<2x4xf32>
    %63 = arith.mulf %62, %61 : vector<2x4xf32>
    %64 = arith.addf %52, %63 : vector<2x4xf32>
    %65 = arith.mulf %62, %62 : vector<2x4xf32>
    %cst_36 = arith.constant -5.000000e-01 : f32
    %66 = vector.broadcast %cst_36 : f32 to vector<2x4xf32>
    %67 = arith.mulf %66, %65 : vector<2x4xf32>
    %68 = arith.subf %67, %60 : vector<2x4xf32>
    %cst_37 = arith.constant dense<0.000000e+00> : vector<2xf32>
    %69 = vector.multi_reduction <add>, %68, %cst_37 [1] : vector<2x4xf32> to vector<2xf32>
    %70 = vector.shape_cast %69 : vector<2xf32> to vector<2x1xf32>
    %cst_38 = arith.constant 3.67575407 : f32
    %71 = vector.broadcast %cst_38 : f32 to vector<2x1xf32>
    %72 = arith.subf %70, %71 : vector<2x1xf32>
    %73 = math.tanh %52 : vector<2x4xf32>
    %74 = math.tanh %64 : vector<2x4xf32>
    %75 = arith.mulf %74, %74 : vector<2x4xf32>
    %cst_39 = arith.constant 1.000000e+00 : f32
    %76 = vector.broadcast %cst_39 : f32 to vector<2x4xf32>
    %77 = arith.subf %76, %75 : vector<2x4xf32>
    %cst_40 = arith.constant 0.000000e+00 : f32
    %78 = vector.broadcast %cst_40 : f32 to vector<2x4xf32>
    %79 = arith.maximumf %77, %78 : vector<2x4xf32>
    %cst_41 = arith.constant 9.99999997E-7 : f32
    %80 = vector.broadcast %cst_41 : f32 to vector<2x4xf32>
    %81 = arith.addf %79, %80 : vector<2x4xf32>
    %82 = math.log %81 : vector<2x4xf32>
    %cst_42 = arith.constant dense<0.000000e+00> : vector<2xf32>
    %83 = vector.multi_reduction <add>, %82, %cst_42 [1] : vector<2x4xf32> to vector<2xf32>
    %84 = vector.shape_cast %83 : vector<2xf32> to vector<2x1xf32>
    %85 = arith.subf %72, %84 : vector<2x1xf32>
    %cst_43 = arith.constant 0.000000e+00 : f32
    %86 = vector.broadcast %cst_43 : f32 to vector<2x128xf32>
    %c0_44 = arith.constant 0 : index
    %c0_45 = arith.constant 0 : index
    %87 = vector.load %arg13[%c0_44, %c0_45] : memref<2x128xf32, #tpu.memory_space<vmem>>, vector<2x128xf32>
    tpu.vector_store %arg13[%c0_44, %c0_45], %86 {strides = array<i32>} : memref<2x128xf32, #tpu.memory_space<vmem>>, vector<2x128xf32>,
    %c0_46 = arith.constant 0 : index
    %c0_47 = arith.constant 0 : index
    %88 = vector.load %arg13[%c0_46, %c0_47] : memref<2x128xf32, #tpu.memory_space<vmem>>, vector<2x4xf32>
    tpu.vector_store %arg13[%c0_46, %c0_47], %73 {strides = array<i32>} : memref<2x128xf32, #tpu.memory_space<vmem>>, vector<2x4xf32>,
    %c0_48 = arith.constant 0 : index
    %c4 = arith.constant 4 : index
    %89 = vector.load %arg13[%c0_48, %c4] : memref<2x128xf32, #tpu.memory_space<vmem>>, vector<2x4xf32>
    tpu.vector_store %arg13[%c0_48, %c4], %74 {strides = array<i32>} : memref<2x128xf32, #tpu.memory_space<vmem>>, vector<2x4xf32>,
    %c0_49 = arith.constant 0 : index
    %c8 = arith.constant 8 : index
    %90 = vector.load %arg13[%c0_49, %c8] : memref<2x128xf32, #tpu.memory_space<vmem>>, vector<2x4xf32>
    tpu.vector_store %arg13[%c0_49, %c8], %60 {strides = array<i32>} : memref<2x128xf32, #tpu.memory_space<vmem>>, vector<2x4xf32>,
    %c0_50 = arith.constant 0 : index
    %c12 = arith.constant 12 : index
    %91 = vector.load %arg13[%c0_50, %c12] : memref<2x128xf32, #tpu.memory_space<vmem>>, vector<2x1xf32>
    tpu.vector_store %arg13[%c0_50, %c12], %85 {strides = array<i32>} : memref<2x128xf32, #tpu.memory_space<vmem>>, vector<2x1xf32>,
    return
  }
  func.func @transform_0(%arg0: i32) -> (i32, i32) {
    %c0_i32 = arith.constant 0 : i32
    %c0_i32_0 = arith.constant 0 : i32
    return %arg0, %c0_i32 : i32, i32
  }
  func.func @transform_1(%arg0: i32) -> (i32, i32) {
    %c0_i32 = arith.constant 0 : i32
    %c0_i32_0 = arith.constant 0 : i32
    %c0_i32_1 = arith.constant 0 : i32
    return %c0_i32, %c0_i32_0 : i32, i32
  }
  func.func @transform_2(%arg0: i32) -> (i32, i32) {
    %c0_i32 = arith.constant 0 : i32
    %c0_i32_0 = arith.constant 0 : i32
    %c0_i32_1 = arith.constant 0 : i32
    return %c0_i32, %c0_i32_0 : i32, i32
  }
  func.func @transform_3(%arg0: i32) -> (i32, i32) {
    %c0_i32 = arith.constant 0 : i32
    %c0_i32_0 = arith.constant 0 : i32
    %c0_i32_1 = arith.constant 0 : i32
    return %c0_i32, %c0_i32_0 : i32, i32
  }
  func.func @transform_4(%arg0: i32) -> (i32, i32) {
    %c0_i32 = arith.constant 0 : i32
    %c0_i32_0 = arith.constant 0 : i32
    %c0_i32_1 = arith.constant 0 : i32
    return %c0_i32, %c0_i32_0 : i32, i32
  }
  func.func @transform_5(%arg0: i32) -> (i32, i32) {
    %c0_i32 = arith.constant 0 : i32
    %c0_i32_0 = arith.constant 0 : i32
    %c0_i32_1 = arith.constant 0 : i32
    return %c0_i32, %c0_i32_0 : i32, i32
  }
  func.func @transform_6(%arg0: i32) -> (i32, i32) {
    %c0_i32 = arith.constant 0 : i32
    %c0_i32_0 = arith.constant 0 : i32
    %c0_i32_1 = arith.constant 0 : i32
    return %c0_i32, %c0_i32_0 : i32, i32
  }
  func.func @transform_7(%arg0: i32) -> (i32, i32) {
    %c0_i32 = arith.constant 0 : i32
    %c0_i32_0 = arith.constant 0 : i32
    %c0_i32_1 = arith.constant 0 : i32
    return %c0_i32, %c0_i32_0 : i32, i32
  }
  func.func @transform_8(%arg0: i32) -> (i32, i32) {
    %c0_i32 = arith.constant 0 : i32
    %c0_i32_0 = arith.constant 0 : i32
    %c0_i32_1 = arith.constant 0 : i32
    return %c0_i32, %c0_i32_0 : i32, i32
  }
  func.func @transform_9(%arg0: i32) -> (i32, i32) {
    %c0_i32 = arith.constant 0 : i32
    %c0_i32_0 = arith.constant 0 : i32
    %c0_i32_1 = arith.constant 0 : i32
    return %c0_i32, %c0_i32_0 : i32, i32
  }
  func.func @transform_10(%arg0: i32) -> (i32, i32) {
    %c0_i32 = arith.constant 0 : i32
    %c0_i32_0 = arith.constant 0 : i32
    %c0_i32_1 = arith.constant 0 : i32
    return %c0_i32, %c0_i32_0 : i32, i32
  }
  func.func @transform_11(%arg0: i32) -> (i32, i32) {
    %c0_i32 = arith.constant 0 : i32
    %c0_i32_0 = arith.constant 0 : i32
    return %arg0, %c0_i32 : i32, i32
  }
  func.func @transform_12(%arg0: i32) -> (i32, i32) {
    %c0_i32 = arith.constant 0 : i32
    %c0_i32_0 = arith.constant 0 : i32
    return %arg0, %c0_i32 : i32, i32
  }
}

</mosaic_0001>

<bundles_post_ra>
// kernel: actor_forward.3
= control target key start
LH: loop header
LB: loop body
LE: loop exit
PB: predicated region body
PF: predicated region fallthrough
CT: control target
= control target key end

     0   :  { %vm113_vm0 = vcmask 1043456   ;;  %v403_v0 = vmov 0.0   ;;  %vm404_vm1 = vmmov 0   ;;  %vm91_vm2 = vcmask 326656   ;;  %s544_s1 = inlined_call_operand.vmem [shape: bf16[40,8], index: 1, kind: input, shape index: {}]   ;;  %s545_s0 = inlined_call_operand.vmem [shape: bf16[112,40], index: 0, kind: input, shape index: {}]   ;;  %s546_s2 = inlined_call_operand.vmem [shape: f32[1,8], index: 2, kind: input, shape index: {}]   ;;  %s547_s3 = inlined_call_operand.vmem [shape: bf16[112,8], index: 3, kind: output, shape index: {}]  }
   0x1   :  { %351 = vmatprep.subr.bf16.mxu0 %v403_v0  ;;  %v393_v1 = vld [vmem:[%s544_s1 + $0x10] ss:$0 sps:$4 sm:$0xff]   ;;  %385 = vmatprep.subr.bf16.mxu1 %v403_v0  ;;  %v394_v3 = vld [vmem:[%s544_s1 + $0x8] sm:$0xff]   ;;  %v395_v4 = vld [vmem:[%s544_s1] sm:$0xff]   ;;  %vm276_vm3 = vcmask 60416  }
   0x2   :  { %357 = vmatprep.mubr.msk.bf16.mxu0 %vm404_vm1, %v403_v0  ;;  %373 = vmatprep.mubr.msk.bf16.mxu1 %vm404_vm1, %v403_v0  ;;  %v115_v2 = vsel %vm113_vm0, %v393_v1, 0  ;;  %v396_v5 = vld [vmem:[%s545_s0] sm:$0xff]   ;;  %v398_v7 = vld [vmem:[%s545_s0 + $0x8] sm:$0xff]   ;;  %v400_v9 = vld [vmem:[%s545_s0 + $0x10] sm:$0xff]  }
   0x3   :  { %352 = vmatpush3.bf16.msra.mxu0 %v115_v2  ;;  %388 = vmatpush3.bf16.msra.mxu1 %v115_v2  ;;  %v397_v6 = vld [vmem:[%s545_s0 + $0x20] sm:$0xff]   ;;  %v399_v8 = vld [vmem:[%s545_s0 + $0x28] sm:$0xff]   ;;  %v401_v10 = vld [vmem:[%s545_s0 + $0x30] sm:$0xff]  }
   0x4   :  { %353 = vmatprep.subr.bf16.mxu0 %v403_v0  ;;  %386 = vmatprep.subr.bf16.mxu1 %v403_v0  ;;  %v402_v11 = vld [vmem:[%s545_s0 + $0x18] sm:$0xff]   ;;  %v472_v12 = vld [vmem:[%s546_s2] ss:$0 sm:$0xff] }
   0x7   :  { %354 = vmatpush3.bf16.msra.mxu0 %v394_v3  ;;  %389 = vmatpush3.bf16.msra.mxu1 %v394_v3 }
   0x8   :  { %355 = vmatprep.subr.bf16.mxu0 %v403_v0  ;;  %387 = vmatprep.subr.bf16.mxu1 %v403_v0 }
   0xb   :  { %356 = vmatpush3.bf16.msra.mxu0 %v395_v4  ;;  %390 = vmatpush3.bf16.msra.mxu1 %v395_v4 }
   0xe   :  { %358 = vmatmul.mubr.msk.bf16.vlgmr.msra.gmra.mxu0 %vm91_vm2, %v396_v5  ;;  %374 = vmatmul.mubr.msk.bf16.vlgmr.msra.gmra.mxu1 %vm91_vm2, %v397_v6 }
   0xf   :  { %361 = vmatprep.mubr.msk.bf16.mxu0 %vm404_vm1, %v403_v0  ;;  %377 = vmatprep.mubr.msk.bf16.mxu1 %vm404_vm1, %v403_v0 }
  0x16   :  { %362 = vmatmul.mubr.msk.bf16.gmra.mxu0 %vm91_vm2, %v398_v7  ;;  %378 = vmatmul.mubr.msk.bf16.gmra.mxu1 %vm91_vm2, %v399_v8 }
  0x17   :  { %365 = vmatprep.mubr.msk.bf16.mxu0 %vm404_vm1, %v403_v0  ;;  %381 = vmatprep.mubr.msk.bf16.mxu1 %vm404_vm1, %v403_v0 }
  0x1e   :  { %366 = vmatmul.mubr.msk.bf16.gmra.mxu0 %vm91_vm2, %v400_v9  ;;  %382 = vmatmul.mubr.msk.bf16.gmra.mxu1 %vm91_vm2, %v401_v10 }
  0x1f   :  { %369 = vmatprep.mubr.msk.bf16.mxu0 %vm404_vm1, %v403_v0 }
  0x26   :  { %370 = vmatmul.mubr.msk.bf16.gmra.mxu0 %vm91_vm2, %v402_v11 }
  0xce   :  { %v151_v13 = vpop.f32.mrf.mxu0  ;;  %v183_v14 = vpop.f32.mrf.mxu1 }
  0xcf   :  { %v152_v15 = vadd.f32 %v472_v12, %v151_v13  ;;  %v184_v16 = vadd.f32 %v472_v12, %v183_v14 }
  0xd0   :  { %v359_v17 = vpop.f32.mrf.mxu0  ;;  %v375_v18 = vpop.f32.mrf.mxu1 }
  0xd1   :  { %v206_v19 = vmax.f32 %v152_v15, 0.0  ;;  %v214_v20 = vmax.f32 %v184_v16, 0.0 }
  0xd2   :  { %v154_v21 = vpop.f32.mrf.mxu0  ;;  %v186_v22 = vpop.f32.mrf.mxu1 }
  0xd3   :  { %v327_v23 = vpack.c.bf16 %v206_v19, %v206_v19  ;;  %v335_v24 = vpack.c.bf16 %v214_v20, %v214_v20  ;;  %v155_v25 = vadd.f32 %v472_v12, %v154_v21  ;;  %v187_v26 = vadd.f32 %v472_v12, %v186_v22 }
  0xd4   :  { %v360_v27 = vpop.f32.mrf.mxu0  ;;  %v376_v28 = vpop.f32.mrf.mxu1 }
  0xd5   :  { %277 = vst.msk [vmem:[%s547_s3] sm:$0xf] %vm276_vm3, %v327_v23  ;;  %285 = vst.msk [vmem:[%s547_s3 + $0x20] sm:$0xf] %vm276_vm3, %v335_v24  ;;  %v207_v29 = vmax.f32 %v155_v25, 0.0  ;;  %v215_v30 = vmax.f32 %v187_v26, 0.0 }
  0xd6   :  { %v159_v31 = vpop.f32.mrf.mxu0  ;;  %v191_v32 = vpop.f32.mrf.mxu1 }
  0xd7   :  { %v328_v33 = vpack.c.bf16 %v207_v29, %v207_v29  ;;  %v336_v34 = vpack.c.bf16 %v215_v30, %v215_v30  ;;  %v160_v35 = vadd.f32 %v472_v12, %v159_v31  ;;  %v192_v36 = vadd.f32 %v472_v12, %v191_v32 }
  0xd8   :  { %v363_v37 = vpop.f32.mrf.mxu0  ;;  %v379_v38 = vpop.f32.mrf.mxu1 }
  0xd9   :  { %278 = vst.msk [vmem:[%s547_s3 + $0x4] sm:$0xf] %vm276_vm3, %v328_v33  ;;  %286 = vst.msk [vmem:[%s547_s3 + $0x24] sm:$0xf] %vm276_vm3, %v336_v34  ;;  %v208_v39 = vmax.f32 %v160_v35, 0.0  ;;  %v216_v40 = vmax.f32 %v192_v36, 0.0 }
  0xda   :  { %v162_v41 = vpop.f32.mrf.mxu0  ;;  %v194_v42 = vpop.f32.mrf.mxu1 }
  0xdb   :  { %v329_v43 = vpack.c.bf16 %v208_v39, %v208_v39  ;;  %v337_v44 = vpack.c.bf16 %v216_v40, %v216_v40  ;;  %v163_v45 = vadd.f32 %v472_v12, %v162_v41  ;;  %v195_v46 = vadd.f32 %v472_v12, %v194_v42 }
  0xdc   :  { %v364_v47 = vpop.f32.mrf.mxu0  ;;  %v380_v48 = vpop.f32.mrf.mxu1 }
  0xdd   :  { %279 = vst.msk [vmem:[%s547_s3 + $0x8] sm:$0xf] %vm276_vm3, %v329_v43  ;;  %287 = vst.msk [vmem:[%s547_s3 + $0x28] sm:$0xf] %vm276_vm3, %v337_v44  ;;  %v209_v49 = vmax.f32 %v163_v45, 0.0  ;;  %v217_v50 = vmax.f32 %v195_v46, 0.0 }
  0xde   :  { %v167_v51 = vpop.f32.mrf.mxu0  ;;  %v199_v52 = vpop.f32.mrf.mxu1 }
  0xdf   :  { %v330_v53 = vpack.c.bf16 %v209_v49, %v209_v49  ;;  %v338_v54 = vpack.c.bf16 %v217_v50, %v217_v50  ;;  %v168_v55 = vadd.f32 %v472_v12, %v167_v51  ;;  %v200_v56 = vadd.f32 %v472_v12, %v199_v52 }
  0xe0   :  { %v367_v57 = vpop.f32.mrf.mxu0  ;;  %v383_v58 = vpop.f32.mrf.mxu1 }
  0xe1   :  { %280 = vst.msk [vmem:[%s547_s3 + $0xc] sm:$0xf] %vm276_vm3, %v330_v53  ;;  %288 = vst.msk [vmem:[%s547_s3 + $0x2c] sm:$0xf] %vm276_vm3, %v338_v54  ;;  %v210_v59 = vmax.f32 %v168_v55, 0.0  ;;  %v218_v60 = vmax.f32 %v200_v56, 0.0 }
  0xe2   :  { %v170_v61 = vpop.f32.mrf.mxu0  ;;  %v202_v62 = vpop.f32.mrf.mxu1 }
  0xe3   :  { %v331_v63 = vpack.c.bf16 %v210_v59, %v210_v59  ;;  %v339_v0 = vpack.c.bf16 %v218_v60, %v218_v60  ;;  %v171_v1 = vadd.f32 %v472_v12, %v170_v61  ;;  %v203_v2 = vadd.f32 %v472_v12, %v202_v62 }
  0xe4   :  { %v368_v3 = vpop.f32.mrf.mxu0  ;;  %v384_v4 = vpop.f32.mrf.mxu1 }
  0xe5   :  { %281 = vst.msk [vmem:[%s547_s3 + $0x10] sm:$0xf] %vm276_vm3, %v331_v63  ;;  %289 = vst.msk [vmem:[%s547_s3 + $0x30] sm:$0xf] %vm276_vm3, %v339_v0  ;;  %v211_v5 = vmax.f32 %v171_v1, 0.0  ;;  %v219_v6 = vmax.f32 %v203_v2, 0.0 }
  0xe6   :  { %v175_v7 = vpop.f32.mrf.mxu0 }
  0xe7   :  { %v332_v8 = vpack.c.bf16 %v211_v5, %v211_v5  ;;  %v340_v9 = vpack.c.bf16 %v219_v6, %v219_v6  ;;  %v176_v10 = vadd.f32 %v472_v12, %v175_v7 }
  0xe8   :  { %v371_v11 = vpop.f32.mrf.mxu0 }
  0xe9   :  { %282 = vst.msk [vmem:[%s547_s3 + $0x14] sm:$0xf] %vm276_vm3, %v332_v8  ;;  %290 = vst.msk [vmem:[%s547_s3 + $0x34] sm:$0xf] %vm276_vm3, %v340_v9  ;;  %v212_v13 = vmax.f32 %v176_v10, 0.0 }
  0xea   :  { %v178_v14 = vpop.f32.mrf.mxu0 }
  0xeb   :  { %v333_v15 = vpack.c.bf16 %v212_v13, %v212_v13  ;;  %v179_v16 = vadd.f32 %v472_v12, %v178_v14 }
  0xec   :  { %v372_v17 = vpop.f32.mrf.mxu0 }
  0xed   :  { %283 = vst.msk [vmem:[%s547_s3 + $0x18] sm:$0xf] %vm276_vm3, %v333_v15  ;;  %v213_v18 = vmax.f32 %v179_v16, 0.0 }
  0xef   :  { %v334_v19 = vpack.c.bf16 %v213_v18, %v213_v18 }
  0xf1   :  { %284 = vst.msk [vmem:[%s547_s3 + $0x1c] sm:$0xf] %vm276_vm3, %v334_v19 }

// kernel: actor_forward.5
= control target key start
LH: loop header
LB: loop body
LE: loop exit
PB: predicated region body
PF: predicated region fallthrough
CT: control target
= control target key end

     0   :  { %v797_v0 = vmov 0   ;;  %v798_v15 = vmov 1966171168   ;;  %v111_v17 = vlaneseq  ;;  %vm274_vm0 = vcmask 64512   ;;  %s802_s19 = smov 4   ;;  %s1018_s1 = inlined_call_operand.vmem [shape: bf16[392,32], index: 1, kind: input, shape index: {}]   ;;  %s1019_s0 = inlined_call_operand.vmem [shape: bf16[2,392], index: 0, kind: input, shape index: {}]   ;;  %s1020_s2 = inlined_call_operand.vmem [shape: f32[1,32], index: 2, kind: input, shape index: {}]   ;;  %s1021_s5 = inlined_call_operand.vmem [shape: bf16[32,32], index: 5, kind: input, shape index: {}]   ;;  %s1022_s7 = inlined_call_operand.vmem [shape: bf16[32,32], index: 7, kind: input, shape index: {}]   ;;  %s1023_s3 = inlined_call_operand.vmem [shape: f32[1,32], index: 3, kind: input, shape index: {}]   ;;  %s1024_s4 = inlined_call_operand.vmem [shape: f32[1,32], index: 4, kind: input, shape index: {}]   ;;  %s1025_s9 = inlined_call_operand.vmem [shape: bf16[32,8], index: 9, kind: input, shape index: {}]   ;;  %s1026_s6 = inlined_call_operand.vmem [shape: f32[1,32], index: 6, kind: input, shape index: {}]   ;;  %s1027_s8 = inlined_call_operand.vmem [shape: f32[1,32], index: 8, kind: input, shape index: {}]   ;;  %s1028_s12 = inlined_call_operand.vmem [shape: f32[2,128], index: 12, kind: output, shape index: {}]   ;;  %s1029_s10 = inlined_call_operand.vmem [shape: f32[1,8], index: 10, kind: input, shape index: {}]   ;;  %s1030_s11 = inlined_call_operand.vmem [shape: f32[2,4], index: 11, kind: input, shape index: {}]  }
   0x1   :  { %322 = vmatprep.subr.bf16.mxu1 %v797_v0  ;;  %v756_v1 = vld [vmem:[%s1018_s1 + $0x78] sm:$0xff]   ;;  %v759_v4 = vld [vmem:[%s1018_s1 + $0x70] sm:$0xff]   ;;  %v762_v7 = vld [vmem:[%s1018_s1 + $0x68] sm:$0xff]   ;;  %v109_v16 = vunpack.c.l.s4 %v798_v15  ;;  %vm278_vm1 = vcmask 1043456   ;;  %vm362_vm2 = vcmask 254976   ;;  %v799_v58 = vmov 0.0  }
   0x2   :  { %v757_v2 = vld [vmem:[%s1018_s1 + $0xb8] sm:$0xff]   ;;  %695 = vmatprep.subr.bf16.mxu0 %v756_v1  ;;  %v760_v5 = vld [vmem:[%s1018_s1 + $0xb0] sm:$0xff]   ;;  %v763_v8 = vld [vmem:[%s1018_s1 + $0xa8] sm:$0xff]   ;;  %v112_v22 = vshrl.u32 %v111_v17, 7  ;;  %vm800_vm3 = vmmov 0   ;;  %vm417_vm4 = vcmask 261120  }
   0x3   :  { %v758_v3 = vld [vmem:[%s1018_s1 + $0x38] sm:$0xff]   ;;  %323 = vmatpush1.bf16.msra.mxu1 %v757_v2  ;;  %v761_v6 = vld [vmem:[%s1018_s1 + $0x30] sm:$0xff]   ;;  %v764_v9 = vld [vmem:[%s1018_s1 + $0x28] sm:$0xff]   ;;  %v110_v21 = vunpack.c.0.s8 %v109_v16  ;;  %633 = vst [vmem:[%s1028_s12] sm:$0x3] %v799_v58  ;;  %vm617_vm5 = vcmask 25600   ;;  %vm639_vm6 = vcmask 58400  }
   0x4   :  { %696 = vmatpush3.bf16.msra.mxu0 %v758_v3  ;;  %324 = vmatprep.subr.bf16.mxu1 %v797_v0  ;;  %v765_v10 = vld [vmem:[%s1018_s1 + $0x60] sm:$0xff]   ;;  %v768_v13 = vld [vmem:[%s1018_s1 + $0x58] sm:$0xff]   ;;  %v771_v19 = vld [vmem:[%s1018_s1 + $0x50] sm:$0xff]   ;;  %vm644_vm7 = vcmask 91200   ;;  %vm646_vm8 = vcmask 99424  }
   0x5   :  { %697 = vmatprep.subr.bf16.mxu0 %v759_v4  ;;  %v766_v11 = vld [vmem:[%s1018_s1 + $0xa0] sm:$0xff]   ;;  %v769_v14 = vld [vmem:[%s1018_s1 + $0x98] sm:$0xff]   ;;  %v772_v20 = vld [vmem:[%s1018_s1 + $0x90] sm:$0xff]   ;;  %v113_v27 = vsub.s32 %v110_v21, %v112_v22 }
   0x6   :  { %v767_v12 = vld [vmem:[%s1018_s1 + $0x20] sm:$0xff]   ;;  %v770_v18 = vld [vmem:[%s1018_s1 + $0x18] sm:$0xff]   ;;  %v773_v23 = vld [vmem:[%s1018_s1 + $0x10] sm:$0xff]  }
   0x7   :  { %325 = vmatpush1.bf16.msra.mxu1 %v760_v5  ;;  %v774_v24 = vld [vmem:[%s1018_s1 + $0x48] sm:$0xff]   ;;  %v653_v28 = vld.sshfl [vmem:[%s1019_s0] sm:$0x33 pattern:$0x75316420] }
   0x8   :  { %698 = vmatpush3.bf16.msra.mxu0 %v761_v6  ;;  %326 = vmatprep.subr.bf16.mxu1 %v797_v0  ;;  %v775_v25 = vld [vmem:[%s1018_s1 + $0x88] sm:$0xff]   ;;  %v777_v29 = vld [vmem:[%s1018_s1 + $0x40] sm:$0xff]   ;;  %v107_v30 = vcombine.high %v653_v28, %v653_v28  ;;  %v114_v36 = vrot.slane %v653_v28, %v113_v27 }
   0x9   :  { %699 = vmatprep.subr.bf16.mxu0 %v762_v7  ;;  %v776_v26 = vld [vmem:[%s1018_s1 + $0x8] sm:$0xff]   ;;  %v778_v31 = vld [vmem:[%s1018_s1 + $0x80] sm:$0xff]  }
   0xa   :  { %v121_v32 = vrot.slane %v107_v30, %v113_v27  ;;  %v779_v33 = vld [vmem:[%s1018_s1] sm:$0xff]   ;;  %v122_v38 = vcombine.high %v114_v36, %v114_v36  ;;  %v781_v57 = vld [vmem:[%s1021_s5 + $0x8] sm:$0xff]  }
   0xb   :  { %327 = vmatpush1.bf16.msra.mxu1 %v763_v8  ;;  %v780_v34 = vld [vmem:[%s1018_s1 + $0xc0] ss:$0 sps:$4 sm:$0xff]   ;;  %v783_v60 = vld [vmem:[%s1022_s7 + $0x8] sm:$0xff]  }
   0xc   :  { %700 = vmatpush3.bf16.msra.mxu0 %v764_v9  ;;  %328 = vmatprep.subr.bf16.mxu1 %v797_v0  ;;  %v123_v35 = vcombine.high %v121_v32, %v121_v32  ;;  %v280_v37 = vsel %vm278_vm1, %v780_v34, 0  ;;  %v652_v41 = vld [vmem:[%s1020_s2] ss:$0 sm:$0xff]  ;;  %v785_v8 = vld [vmem:[%s1025_s9 + $0x8] sm:$0xff]  }
   0xd   :  { %701 = vmatprep.subr.bf16.mxu0 %v765_v10  ;;  %314 = vmatprep.mubr.bf16.mxu0 %v121_v32  ;;  %v782_v59 = vld [vmem:[%s1021_s5] sm:$0xff]  }
   0xe   :  { %679 = vmatprep.mubr.msk.bf16.mxu1 %vm274_vm0, %v123_v35  ;;  %v680_v1 = vld [vmem:[%s1023_s3] ss:$0 sm:$0xff] }
   0xf   :  { %329 = vmatpush1.bf16.msra.mxu1 %v766_v11  ;;  %v681_v3 = vld [vmem:[%s1024_s4] ss:$0 sm:$0xff] }
  0x10   :  { %702 = vmatpush3.bf16.msra.mxu0 %v767_v12  ;;  %330 = vmatprep.subr.bf16.mxu1 %v797_v0  ;;  %v784_v7 = vld [vmem:[%s1022_s7] sm:$0xff]  }
  0x11   :  { %703 = vmatprep.subr.bf16.mxu0 %v768_v13  ;;  %v682_v9 = vld [vmem:[%s1026_s6] ss:$0 sm:$0xff] }
  0x12   :  { %v786_v17 = vld [vmem:[%s1025_s9] sm:$0xff]  }
  0x13   :  { %331 = vmatpush1.bf16.msra.mxu1 %v769_v14 }
  0x14   :  { %704 = vmatpush3.bf16.msra.mxu0 %v770_v18  ;;  %332 = vmatprep.subr.bf16.mxu1 %v797_v0  ;;  %v686_v18 = vld [vmem:[%s1027_s8] ss:$0 sm:$0xff] }
  0x15   :  { %705 = vmatprep.subr.bf16.mxu0 %v771_v19 }
  0x17   :  { %333 = vmatpush1.bf16.msra.mxu1 %v772_v20 }
  0x18   :  { %706 = vmatpush3.bf16.msra.mxu0 %v773_v23  ;;  %334 = vmatprep.subr.bf16.mxu1 %v797_v0 }
  0x19   :  { %707 = vmatprep.subr.bf16.mxu0 %v774_v24 }
  0x1b   :  { %335 = vmatpush1.bf16.msra.mxu1 %v775_v25 }
  0x1c   :  { %708 = vmatpush3.bf16.msra.mxu0 %v776_v26  ;;  %336 = vmatprep.subr.bf16.mxu1 %v797_v0  ;;  %v690_v26 = vld [vmem:[%s1029_s10] ss:$0 sm:$0xff]  ;;  %s801_s10 = smov 124  }
  0x1d   :  { %709 = vmatprep.subr.bf16.mxu0 %v777_v29 }
  0x1f   :  { %337 = vmatpush1.bf16.msra.mxu1 %v778_v31 }
  0x20   :  { %710 = vmatpush3.bf16.msra.mxu0 %v779_v33  ;;  %352 = vmatprep.subr.bf16.mxu1 %v797_v0 }
  0x21   :  { %726 = vmatprep.subr.bf16.mxu0 %v799_v58 }
  0x23   :  { %315 = vmatmul.mubr.bf16.vlgmr.msra.gmra.mxu0 %v114_v36  ;;  %353 = vmatpush2.bf16.msra.mxu1 %v280_v37 }
  0x24   :  { %734 = vmatprep.subr.bf16.mxu1 %v799_v58  ;;  %727 = vmatpush3.bf16.msra.mxu0 %v781_v57 }
  0x25   :  { %730 = vmatprep.mubr.msk.bf16.mxu0 %vm800_vm3, %v799_v58  ;;  %728 = vmatprep.subr.bf16.mxu0 %v799_v58 }
  0x26   :  { %355 = vmatmul.mubr.bf16.vlgmr.msra.gmra.mxu1 %v122_v38  ;;  %v603_v38 = vld [vmem:[%s1030_s11] sm:$0x3] }
  0x27   :  { %738 = vmatprep.mubr.msk.bf16.mxu1 %vm800_vm3, %v799_v58  ;;  %735 = vmatpush3.bf16.msra.mxu1 %v783_v60 }
  0x28   :  { %729 = vmatpush3.bf16.msra.mxu0 %v782_v59  ;;  %736 = vmatprep.subr.bf16.mxu1 %v799_v58 }
  0x29   :  { %742 = vmatprep.subr.bf16.mxu0 %v799_v58 }
  0x2b   :  { %737 = vmatpush3.bf16.msra.mxu1 %v784_v7 }
  0xe3   :  { %v711_v39 = vpop.f32.mrf.mxu0 }
  0xe5   :  { %v712_v40 = vpop.f32.mrf.mxu0 }
  0xe6   :  { %v713_v42 = vadd.f32 %v712_v40, %v711_v39  ;;  %v356_v43 = vpop.f32.mrf.mxu1  ;;  %v610_v39 = vmul.f32 %v603_v38, %v603_v38 }
  0xe7   :  { %v714_v44 = vpop.f32.mrf.mxu0 }
  0xe8   :  { %v317_v45 = vadd.f32 %v713_v42, %v652_v41  ;;  %v358_v46 = vpop.f32.mrf.mxu1  ;;  %v611_v42 = vmul.f32 -0.5, %v610_v39 }
  0xe9   :  { %v715_v47 = vpop.f32.mrf.mxu0 }
  0xea   :  { %v357_v48 = vadd.f32 %v356_v43, %v317_v45  ;;  %v359_v49 = vpop.f32.mrf.mxu1 }
  0xec   :  { %v360_v50 = vpop.f32.mrf.mxu1  ;;  %v363_v51 = vsel %vm362_vm2, %v357_v48, 0.0 }
  0xed   :  { %364 = vadd.xlane.f32.xlu0 %v363_v51 }
 0x176   :  { %v365_v52 = vpop.xlane.xlu0 %364 }
 0x177   :  { %v367_v53 = vmul.f32 0.03125, %v365_v52 }
 0x179   :  { %v368_v54 = vsub.f32 %v357_v48, %v367_v53 }
 0x17b   :  { %v369_v55 = vmul.f32 %v368_v54, %v368_v54 }
 0x17d   :  { %v370_v56 = vsel %vm362_vm2, %v369_v55, 0.0 }
 0x17e   :  { %371 = vadd.xlane.f32.xlu0 %v370_v56 }
 0x207   :  { %v372_v61 = vpop.xlane.xlu0 %371 }
 0x208   :  { %v373_v62 = vmul.f32 0.03125, %v372_v61 }
 0x20a   :  { %v374_v63 = vadd.f32 1e-05, %v373_v62 }
 0x20c   :  { %787 = vrsqrt.f32 %v374_v63 }
 0x219   :  { %v788_v0 = vpop.eup %787 }
 0x21a   :  { %v376_v2 = vmul.f32 %v788_v0, %v368_v54 }
 0x21c   :  { %v384_v4 = vmul.f32 %v680_v1, %v376_v2 }
 0x21e   :  { %v392_v5 = vadd.f32 %v681_v3, %v384_v4 }
 0x220   :  { %v393_v6 = vpack.c.bf16 %v392_v5, %v392_v5 }
 0x222   :  { %731 = vmatmul.mubr.msk.bf16.vlgmr.msra.gmra.mxu0 %vm417_vm4, %v393_v6 }
 0x223   :  { %746 = vmatprep.mubr.msk.bf16.mxu0 %vm800_vm3, %v799_v58  ;;  %743 = vmatpush3.bf16.msra.mxu0 %v785_v8 }
 0x224   :  { %744 = vmatprep.subr.bf16.mxu0 %v799_v58 }
 0x227   :  { %745 = vmatpush3.bf16.msra.mxu0 %v786_v17 }
 0x2e2   :  { %v455_v10 = vpop.f32.mrf.mxu0 }
 0x2e3   :  { %v456_v11 = vadd.f32 %v682_v9, %v455_v10 }
 0x2e4   :  { %v732_v12 = vpop.f32.mrf.mxu0 }
 0x2e5   :  { %v461_v13 = vmax.f32 %v456_v11, 0.0 }
 0x2e6   :  { %v458_v14 = vpop.f32.mrf.mxu0 }
 0x2e7   :  { %v462_v15 = vpack.c.bf16 %v461_v13, %v461_v13 }
 0x2e8   :  { %v733_v16 = vpop.f32.mrf.mxu0 }
 0x2e9   :  { %739 = vmatmul.mubr.msk.bf16.vlgmr.msra.gmra.mxu1 %vm417_vm4, %v462_v15 }
 0x3a9   :  { %v523_v19 = vpop.f32.mrf.mxu1 }
 0x3aa   :  { %v524_v20 = vadd.f32 %v686_v18, %v523_v19 }
 0x3ab   :  { %v740_v21 = vpop.f32.mrf.mxu1 }
 0x3ac   :  { %v529_v22 = vmax.f32 %v524_v20, 0.0 }
 0x3ad   :  { %v526_v23 = vpop.f32.mrf.mxu1 }
 0x3ae   :  { %v530_v24 = vpack.c.bf16 %v529_v22, %v529_v22 }
 0x3af   :  { %v741_v25 = vpop.f32.mrf.mxu1 }
 0x3b0   :  { %747 = vmatmul.mubr.msk.bf16.vlgmr.msra.gmra.mxu0 %vm417_vm4, %v530_v24 }
 0x470   :  { %v591_v27 = vpop.f32.mrf.mxu0 }
 0x471   :  { %v592_v28 = vadd.f32 %v690_v26, %v591_v27 }
 0x472   :  { %v748_v29 = vpop.f32.mrf.mxu0 }
 0x473   :  { %789 = vtanh.f32 %v592_v28 }
 0x474   :  { %v594_v30 = vpop.f32.mrf.mxu0 }
 0x476   :  { %v749_v31 = vpop.f32.mrf.mxu0 }
 0x480   :  { %v790_v32 = vpop.eup %789 }
 0x481   :  { %v598_v33 = vadd.f32 1.0, %v790_v32  ;;  %634 = vst.msk [vmem:[%s1028_s12] sm:$0x3] %vm617_vm5, %v790_v32 }
 0x483   :  { %v599_v34 = vmul.f32 6.0, %v598_v33 }
 0x485   :  { %v600_v35 = vadd.f32 -10.0, %v599_v34 }
 0x487   :  { %v601_v36 = vmul.f32 1.442695, %v600_v35 }
 0x489   :  { %791 = vpow2.f32 %v601_v36 }
 0x496   :  { %v792_v37 = vpop.eup %791 }
 0x497   :  { %605 = vrot.lane.b32.xlu1 %v792_v37, %s801_s10 }
 0x49b   :  { %613 = vrot.lane.b32.xlu1 %v600_v35, %s801_s10 }
 0x509   :  { %v606_v40 = vpop.permute.xlu1 %605 }
 0x50a   :  { %v608_v41 = vmul.f32 %v606_v40, %v603_v38 }
 0x50c   :  { %v609_v43 = vadd.f32 %v608_v41, %v592_v28 }
 0x50d   :  { %v614_v44 = vpop.permute.xlu1 %613 }
 0x50e   :  { %793 = vtanh.f32 %v609_v43  ;;  %v616_v45 = vsub.f32 %v611_v42, %v614_v44 }
 0x510   :  { %v618_v46 = vsel %vm617_vm5, %v616_v45, 0.0 }
 0x511   :  { %619 = vadd.xlane.f32.xlu0 %v618_v46 }
 0x51b   :  { %v794_v47 = vpop.eup %793 }
 0x51c   :  { %v623_v48 = vmul.f32 %v794_v47, %v794_v47 }
 0x51e   :  { %v624_v49 = vsub.f32 1.0, %v623_v48 }
 0x520   :  { %v625_v50 = vmax.f32 %v624_v49, 0.0 }
 0x522   :  { %v626_v51 = vadd.f32 1e-06, %v625_v50 }
 0x524   :  { %795 = vlog2.f32 %v626_v51 }
 0x527   :  { %636 = vrot.lane.b32.xlu0 %v794_v47, %s802_s19 }
 0x52b   :  { %641 = vrot.lane.b32.xlu0 %v600_v35, %s802_s19 }
 0x531   :  { %v796_v52 = vpop.eup %795 }
 0x532   :  { %v628_v53 = vmul.f32 0.6931472, %v796_v52 }
 0x534   :  { %v629_v54 = vsel %vm617_vm5, %v628_v53, 0.0 }
 0x535   :  { %630 = vadd.xlane.f32.xlu1 %v629_v54 }
 0x59a   :  { %v620_v55 = vpop.xlane.xlu0 %619 }
 0x59b   :  { %v694_v58 = vadd.f32 -3.675754, %v620_v55 }
 0x59e   :  { %v637_v56 = vpop.permute.xlu0 %636 }
 0x59f   :  { %640 = vst.msk [vmem:[%s1028_s12] sm:$0x3] %vm639_vm6, %v637_v56 }
 0x5a2   :  { %v642_v57 = vpop.permute.xlu0 %641 }
 0x5a3   :  { %645 = vst.msk [vmem:[%s1028_s12] sm:$0x3] %vm644_vm7, %v642_v57 }
 0x5be   :  { %v631_v59 = vpop.xlane.xlu1 %630 }
 0x5bf   :  { %v632_v60 = vsub.f32 %v694_v58, %v631_v59 }
 0x5c1   :  { %647 = vst.msk [vmem:[%s1028_s12] sm:$0x3] %vm646_vm8, %v632_v60 }

// kernel: actor_forward.4
= control target key start
LH: loop header
LB: loop body
LE: loop exit
PB: predicated region body
PF: predicated region fallthrough
CT: control target
= control target key end

     0   :  { %vm69_vm0 = vcmask 1043456   ;;  %v2305_v0 = vmov 0.0   ;;  %vm2306_vm1 = vmmov 0   ;;  %vm59_vm2 = vcmask 64512   ;;  %s2945_s1 = inlined_call_operand.vmem [shape: bf16[9,8,8], index: 1, kind: input, shape index: {}]   ;;  %s2946_s0 = inlined_call_operand.vmem [shape: bf16[2,49,8], index: 0, kind: input, shape index: {}]   ;;  %s2947_s3 = inlined_call_operand.vmem [shape: bf16[2,49,8], index: 3, kind: output, shape index: {}]   ;;  %s2948_s2 = inlined_call_operand.vmem [shape: f32[1,8], index: 2, kind: input, shape index: {}]  }
   0x1   :  { %2034 = vmatprep.subr.bf16.mxu1 %v2305_v0  ;;  %v20_v1 = vld [vmem:[%s2945_s1] sm:$0xf]  ;;  %2020 = vmatprep.subr.bf16.mxu0 %v2305_v0  ;;  %v1794_v2 = vld [vmem:[%s2945_s1 + $0x4] sm:$0xf]  ;;  %v2355_v8 = vld [vmem:[%s2946_s0 + $0x8] sm:$0xff]   ;;  %vm204_vm5 = vcmask 1046528  }
   0x2   :  { %v15_v3 = vld [vmem:[%s2946_s0] sm:$0xf]  ;;  %v136_v4 = vsel %vm69_vm0, %v20_v1, 0  ;;  %2036 = vmatprep.mubr.msk.bf16.mxu1 %vm2306_vm1, %v2305_v0  ;;  %v71_v5 = vsel %vm69_vm0, %v1794_v2, 0  ;;  %v2346_v6 = vld [vmem:[%s2946_s0 + $0x4] sm:$0xf]  ;;  %2022 = vmatprep.mubr.msk.bf16.mxu0 %vm2306_vm1, %v2305_v0 }
   0x3   :  { %2035 = vmatpush3.bf16.msra.mxu1 %v136_v4  ;;  %2021 = vmatpush3.bf16.msra.mxu0 %v71_v5  ;;  %v1795_v7 = vcombine.low %v15_v3, %v2346_v6  ;;  %v1810_v11 = vld [vmem:[%s2945_s1 + $0xc] sm:$0xf]  ;;  %v283_v12 = vld [vmem:[%s2946_s0] sm:$0x8]  ;;  %v45_v13 = vshll.u32 %v2355_v8, 16  ;;  %v49_v20 = vshrl.u32 %v2355_v8, 16 }
   0x4   :  { %2048 = vmatprep.subr.bf16.mxu0 %v2305_v0  ;;  %2062 = vmatprep.subr.bf16.mxu1 %v2305_v0  ;;  %v325_v14 = vsel %vm69_vm0, %v1810_v11, 0  ;;  %v1804_v16 = vld [vmem:[%s2945_s1 + $0x8] sm:$0xf]  ;;  %v2279_v17 = vld [vmem:[%s2946_s0 + $0x10] ss:$0 sps:$4 sm:$0x11]   ;;  %v1811_v22 = vcombine.low %v283_v12, %v2346_v6 }
   0x5   :  { %v38_v9 = vshrl.u32 %v1795_v7, 16  ;;  %v40_v10 = vshll.u32 %v1795_v7, 16  ;;  %vm36_vm3 = vsmask.f32 7424  ;;  %v47_v18 = vrot.slane %v45_v13, 1  ;;  %v2488_v12 = vld [vmem:[%s2946_s0 + $0xc] sm:$0xff]  }
   0x6   :  { %2037 = vmatmul.mubr.msk.bf16.vlgmr.msra.gmra.mxu1 %vm59_vm2, %v1795_v7  ;;  %v53_v21 = vshll.u32 %v2279_v17, 16  ;;  %v220_v23 = vsel %vm69_vm0, %v1804_v16, 0  ;;  %v295_v27 = vshrl.u32 %v1811_v22, 16  ;;  %v298_v28 = vshll.u32 %v1811_v22, 16  ;;  %v2280_v32 = vld [vmem:[%s2946_s0 + $0x10] ss:$0 sps:$4 sm:$0xff]  }
   0x7   :  { %v42_v15 = vrot.slane %v40_v10, 1  ;;  %2063 = vmatpush3.bf16.msra.mxu1 %v325_v14  ;;  %2040 = vmatprep.mubr.msk.bf16.mxu1 %vm2306_vm1, %v2305_v0  ;;  %v51_v25 = vor.u32 %v49_v20, %v47_v18  ;;  %v1837_v33 = vld [vmem:[%s2945_s1 + $0x20] sm:$0xf]  ;;  %v303_v34 = vrot.slane %v45_v13, 4  ;;  %v302_v35 = vrot.slane %v49_v20, 3 }
   0x8   :  { %2090 = vmatprep.subr.bf16.mxu1 %v2305_v0  ;;  %v55_v26 = vrot.slane %v53_v21, 1  ;;  %v297_v30 = vrot.slane %v295_v27, 3  ;;  %v300_v31 = vrot.slane %v298_v28, 4  ;;  %v1855_v36 = vld [vmem:[%s2945_s1 + $0x4] sm:$0xf]  ;;  %v2400_v37 = vsel %vm69_vm0, %v1837_v33, 0 }
   0x9   :  { %v43_v19 = vor.u32 %v42_v15, %v38_v9  ;;  %v194_v38 = vld [vmem:[%s2946_s0] sm:$0xe]  ;;  %v307_v39 = vshrl.u32 %v2280_v32, 16  ;;  %v310_v40 = vshll.u32 %v2280_v32, 16  ;;  %v2409_v41 = vsel %vm69_vm0, %v1855_v36, 0 }
   0xa   :  { %v56_v29 = vsel %vm36_vm3, %v51_v25, %v55_v26  ;;  %v301_v42 = vor.u32 %v300_v31, %v297_v30  ;;  %v304_v43 = vor.u32 %v303_v34, %v302_v35  ;;  %v57_v44 = vshrl.u32 %v2279_v17, 16  ;;  %v1823_v46 = vld [vmem:[%s2945_s1 + $0x14] sm:$0xf]  ;;  %v918_v47 = vld [vmem:[%s2945_s1] sm:$0xf] }
   0xb   :  { %v48_v24 = vsel %vm36_vm3, %v43_v19, %v47_v18  ;;  %vm293_vm4 = vsmask.f32 4352  ;;  %v1805_v45 = vcombine.low %v194_v38, %v2346_v6  ;;  %v309_v48 = vrot.slane %v307_v39, 3  ;;  %v1867_v50 = vld [vmem:[%s2945_s1 + $0x8] sm:$0xf] }
   0xc   :  { %2023 = vmatmul.mubr.msk.bf16.vlgmr.msra.gmra.mxu0 %vm59_vm2, %v48_v24  ;;  %v312_v49 = vrot.slane %v310_v40, 4  ;;  %v305_v51 = vsel %vm293_vm4, %v301_v42, %v304_v43  ;;  %v2425_v52 = vsel %vm69_vm0, %v918_v47, 0  ;;  %v2428_v53 = vsel %vm69_vm0, %v1867_v50, 0  ;;  %v1816_v57 = vld [vmem:[%s2945_s1 + $0x10] sm:$0xf] }
   0xd   :  { %2049 = vmatpush3.bf16.msra.mxu0 %v220_v23  ;;  %2026 = vmatprep.mubr.msk.bf16.mxu0 %vm2306_vm1, %v2305_v0  ;;  %v512_v54 = vsel %vm69_vm0, %v1823_v46, 0  ;;  %v205_v55 = vrot.slane %v1805_v45, 1  ;;  %v206_v56 = vrot.slane %v2355_v8, 1  ;;  %v1875_v59 = vld [vmem:[%s2945_s1 + $0xc] sm:$0xf]  ;;  %v418_v4 = vsel %vm69_vm0, %v1816_v57, 0 }
   0xe   :  { %2041 = vmatmul.mubr.msk.bf16.gmra.mxu1 %vm59_vm2, %v2355_v8  ;;  %2076 = vmatprep.subr.bf16.mxu0 %v2305_v0  ;;  %v313_v58 = vor.u32 %v312_v49, %v309_v48  ;;  %v1886_v60 = vld [vmem:[%s2945_s1 + $0x10] sm:$0xf]  ;;  %v388_v61 = vld [vmem:[%s2946_s0 + $0x4] sm:$0xf]  ;;  %v389_v62 = vld [vmem:[%s2946_s0 + $0x8] sm:$0xf] }
   0xf   :  { %2044 = vmatprep.mubr.msk.bf16.mxu1 %vm2306_vm1, %v2305_v0  ;;  %v2455_v63 = vsel %vm69_vm0, %v1875_v59, 0  ;;  %v207_v1 = vsel %vm204_vm5, %v205_v55, %v206_v56  ;;  %v2281_v2 = vld [vmem:[%s2946_s0 + $0x10] ss:$0 sps:$4 sm:$0x33]   ;;  %v2462_v3 = vsel %vm69_vm0, %v1886_v60, 0  ;;  %v1817_v7 = vcombine.low %v388_v61, %v389_v62 }
  0x10   :  { %v1893_v5 = vld [vmem:[%s2945_s1 + $0x14] sm:$0xf]  ;;  %v314_v6 = vsel %vm293_vm4, %v304_v43, %v313_v58  ;;  %v1899_v9 = vld [vmem:[%s2945_s1 + $0x18] sm:$0xf]  ;;  %v208_v11 = vrot.slane %v2281_v2, 1  ;;  %v493_v23 = vshrl.u32 %v2488_v12, 16 }
  0x11   :  { %v2470_v8 = vsel %vm69_vm0, %v1893_v5, 0  ;;  %v2477_v10 = vsel %vm69_vm0, %v1899_v9, 0  ;;  %v485_v13 = vshll.u32 %v1817_v7, 16  ;;  %v483_v15 = vshrl.u32 %v1817_v7, 16  ;;  %v1833_v21 = vld [vmem:[%s2945_s1 + $0x1c] sm:$0xf] }
  0x12   :  { %v209_v14 = vsel %vm204_vm5, %v206_v56, %v208_v11  ;;  %v2284_v20 = vld [vmem:[%s2946_s0 + $0x14] ss:$0 sps:$4 sm:$0x11]   ;;  %v697_v25 = vsel %vm69_vm0, %v1833_v21, 0  ;;  %v1905_v26 = vld [vmem:[%s2945_s1 + $0x1c] sm:$0xf] }
  0x13   :  { %v487_v16 = vrot.slane %v485_v13, 1  ;;  %v496_v24 = vshll.u32 %v2284_v20, 16  ;;  %v2514_v27 = vsel %vm69_vm0, %v1905_v26, 0  ;;  %v1914_v28 = vld [vmem:[%s2945_s1 + $0x20] sm:$0xf]  ;;  %v500_v40 = vshrl.u32 %v2284_v20, 16 }
  0x14   :  { %2027 = vmatmul.mubr.msk.bf16.gmra.mxu0 %vm59_vm2, %v56_v29  ;;  %v2521_v29 = vsel %vm69_vm0, %v1914_v28, 0  ;;  %v1827_v30 = vld [vmem:[%s2945_s1 + $0x18] sm:$0xf]  ;;  %v575_v33 = vld [vmem:[%s2946_s0 + $0x4] sm:$0x8]  ;;  %v674_v42 = vrot.slane %v493_v23, 3 }
  0x15   :  { %2030 = vmatprep.mubr.msk.bf16.mxu0 %vm2306_vm1, %v2305_v0  ;;  %v488_v18 = vor.u32 %v487_v16, %v483_v15  ;;  %v498_v32 = vrot.slane %v496_v24, 1  ;;  %v601_v34 = vsel %vm69_vm0, %v1827_v30, 0  ;;  %v1828_v36 = vcombine.low %v575_v33, %v389_v62  ;;  %v2286_v46 = vld [vmem:[%s2946_s0 + $0x14] ss:$0 sps:$4 sm:$0xff]   ;;  %v1850_v59 = vld [vmem:[%s2946_s0 + $0x1c] sm:$0xf] }
  0x16   :  { %2045 = vmatmul.mubr.msk.bf16.gmra.mxu1 %vm59_vm2, %v2279_v17  ;;  %v489_v17 = vshll.u32 %v2488_v12, 16  ;;  %v679_v49 = vshrl.u32 %v2286_v46, 16  ;;  %v682_v50 = vshll.u32 %v2286_v46, 16  ;;  %v587_v57 = vrot.slane %v2488_v12, 3  ;;  %v2566_v60 = vld [vmem:[%s2946_s0 + $0x20] sm:$0xf] }
  0x17   :  { %2064 = vmatprep.mubr.msk.bf16.mxu1 %vm2306_vm1, %v2305_v0  ;;  %v667_v38 = vshrl.u32 %v1828_v36, 16  ;;  %v670_v39 = vshll.u32 %v1828_v36, 16  ;;  %v586_v56 = vrot.slane %v1828_v36, 3  ;;  %vm585_vm6 = vcmask 1044480   ;;  %v2583_v2 = vld [vmem:[%s2946_s0 + $0x24] sm:$0xff]  }
  0x18   :  { %v491_v19 = vrot.slane %v489_v17, 1  ;;  %v675_v45 = vrot.slane %v489_v17, 4  ;;  %v684_v55 = vrot.slane %v682_v50, 4  ;;  %v2292_v24 = vld [vmem:[%s2946_s0 + $0x18] ss:$0 sps:$4 sm:$0x11]  }
  0x19   :  { %v669_v43 = vrot.slane %v667_v38, 3  ;;  %v588_v61 = vsel %vm585_vm6, %v586_v56, %v587_v57  ;;  %v2294_v26 = vld [vmem:[%s2946_s0 + $0x2c] ss:$0 sps:$4 sm:$0x33]   ;;  %v1881_v33 = vld [vmem:[%s2946_s0 + $0x20] sm:$0xf] }
  0x1a   :  { %v492_v22 = vsel %vm36_vm3, %v488_v18, %v491_v19  ;;  %v495_v31 = vor.u32 %v493_v23, %v491_v19  ;;  %v2289_v18 = vld [vmem:[%s2946_s0 + $0x8] sm:$0xff]   ;;  %v1098_v23 = vrot.slane %v2583_v2, 1  ;;  %v1100_v28 = vrot.slane %v2294_v26, 1 }
  0x1b   :  { %v2297_v50 = vld [vmem:[%s2946_s0 + $0x28] sm:$0xff]   ;;  %vm891_vm7 = vcmask 60416   ;;  %vm896_vm8 = vcmask 57344   ;;  %vm897_vm9 = vsmask.f32 256 }
  0x1c   :  { %2031 = vmatmul.mubr.msk.bf16.gmra.mxu0 %vm59_vm2, %v57_v44  ;;  %v499_v35 = vsel %vm36_vm3, %v495_v31, %v498_v32  ;;  %v672_v44 = vrot.slane %v670_v39, 4  ;;  %v1101_v30 = vsel %vm204_vm5, %v1098_v23, %v1100_v28  ;;  %vm2772_vm10 = vmand %vm896_vm8, %vm897_vm9  ;;  %vm903_vm11 = vsmask.f32 7938 }
  0x1d   :  { %2050 = vmatprep.mubr.msk.bf16.mxu0 %vm2306_vm1, %v2305_v0  ;;  %vm2874_vm12 = vmand %vm891_vm7, %vm903_vm11 }
  0x1e   :  { %2065 = vmatmul.mubr.msk.bf16.vlgmr.msra.gmra.mxu1 %vm59_vm2, %v305_v51  ;;  %v673_v47 = vor.u32 %v672_v44, %v669_v43 }
  0x1f   :  { %2091 = vmatpush3.bf16.msra.mxu1 %v512_v54  ;;  %2068 = vmatprep.mubr.msk.bf16.mxu1 %vm2306_vm1, %v2305_v0  ;;  %v681_v54 = vrot.slane %v679_v49, 3 }
  0x20   :  { %2118 = vmatprep.subr.bf16.mxu1 %v2305_v0 }
  0x21   :  { %v685_v58 = vor.u32 %v684_v55, %v681_v54 }
  0x24   :  { %2051 = vmatmul.mubr.msk.bf16.vlgmr.msra.gmra.mxu0 %vm59_vm2, %v207_v1  ;;  %v589_v1 = vrot.slane %v2286_v46, 3 }
  0x25   :  { %2077 = vmatpush3.bf16.msra.mxu0 %v418_v4  ;;  %2054 = vmatprep.mubr.msk.bf16.mxu0 %vm2306_vm1, %v2305_v0 }
  0x26   :  { %2069 = vmatmul.mubr.msk.bf16.gmra.mxu1 %vm59_vm2, %v314_v6  ;;  %2104 = vmatprep.subr.bf16.mxu0 %v2305_v0  ;;  %v590_v5 = vsel %vm585_vm6, %v587_v57, %v589_v1 }
  0x27   :  { %2072 = vmatprep.mubr.msk.bf16.mxu1 %vm2306_vm1, %v2305_v0 }
  0x2c   :  { %2055 = vmatmul.mubr.msk.bf16.gmra.mxu0 %vm59_vm2, %v209_v14  ;;  %v945_v14 = vshrl.u32 %v2583_v2, 16 }
  0x2d   :  { %2058 = vmatprep.mubr.msk.bf16.mxu0 %vm2306_vm1, %v2305_v0 }
  0x2e   :  { %2073 = vmatmul.mubr.msk.bf16.gmra.mxu1 %vm59_vm2, %v309_v48  ;;  %v676_v48 = vor.u32 %v675_v45, %v674_v42 }
  0x2f   :  { %2092 = vmatprep.mubr.msk.bf16.mxu1 %vm2306_vm1, %v2305_v0 }
  0x30   :  { %v677_v51 = vsel %vm293_vm4, %v673_v47, %v676_v48  ;;  %v686_v62 = vsel %vm293_vm4, %v676_v48, %v685_v58  ;;  %v1473_v58 = vrot.slane %v2297_v50, 3 }
  0x34   :  { %2059 = vmatmul.mubr.msk.bf16.gmra.mxu0 %vm59_vm2, %v208_v11 }
  0x35   :  { %2078 = vmatprep.mubr.msk.bf16.mxu0 %vm2306_vm1, %v2305_v0 }
  0x36   :  { %2093 = vmatmul.mubr.msk.bf16.vlgmr.msra.gmra.mxu1 %vm59_vm2, %v492_v22 }
  0x37   :  { %2119 = vmatpush3.bf16.msra.mxu1 %v697_v25  ;;  %2096 = vmatprep.mubr.msk.bf16.mxu1 %vm2306_vm1, %v2305_v0 }
  0x38   :  { %2146 = vmatprep.subr.bf16.mxu1 %v2305_v0 }
  0x3c   :  { %2079 = vmatmul.mubr.msk.bf16.vlgmr.msra.gmra.mxu0 %vm59_vm2, %v1817_v7  ;;  %v941_v7 = vshll.u32 %v2583_v2, 16 }
  0x3d   :  { %2105 = vmatpush3.bf16.msra.mxu0 %v601_v34  ;;  %2082 = vmatprep.mubr.msk.bf16.mxu0 %vm2306_vm1, %v2305_v0  ;;  %v1882_v34 = vld [vmem:[%s2946_s0 + $0x24] sm:$0xf] }
  0x3e   :  { %2097 = vmatmul.mubr.msk.bf16.gmra.mxu1 %vm59_vm2, %v499_v35  ;;  %2132 = vmatprep.subr.bf16.mxu0 %v2305_v0  ;;  %v943_v11 = vrot.slane %v941_v7, 1  ;;  %v1192_v35 = vrot.slane %v945_v14, 3  ;;  %v1193_v39 = vrot.slane %v941_v7, 4  ;;  %v1887_v42 = vcombine.low %v1881_v33, %v1882_v34 }
  0x3f   :  { %2100 = vmatprep.mubr.msk.bf16.mxu1 %vm2306_vm1, %v2305_v0 }
  0x40   :  { %v947_v16 = vor.u32 %v945_v14, %v943_v11  ;;  %v1194_v44 = vor.u32 %v1193_v39, %v1192_v35  ;;  %v1373_v56 = vshll.u32 %v1887_v42, 16 }
  0x44   :  { %2083 = vmatmul.mubr.msk.bf16.gmra.mxu0 %vm59_vm2, %v2488_v12  ;;  %v2598_v12 = vld [vmem:[%s2946_s0 + $0x2c] ss:$0 sps:$4 sm:$0x11]  }
  0x45   :  { %2086 = vmatprep.mubr.msk.bf16.mxu0 %vm2306_vm1, %v2305_v0  ;;  %v949_v15 = vshll.u32 %v2598_v12, 16 }
  0x46   :  { %2101 = vmatmul.mubr.msk.bf16.gmra.mxu1 %vm59_vm2, %v500_v40  ;;  %v2298_v40 = vld [vmem:[%s2946_s0 + $0x2c] ss:$0 sps:$4 sm:$0xff]  }
  0x47   :  { %2120 = vmatprep.mubr.msk.bf16.mxu1 %vm2306_vm1, %v2305_v0  ;;  %v951_v17 = vrot.slane %v949_v15, 1  ;;  %v1197_v45 = vshrl.u32 %v2298_v40, 16  ;;  %v1200_v46 = vshll.u32 %v2298_v40, 16 }
  0x49   :  { %v952_v19 = vsel %vm36_vm3, %v947_v16, %v951_v17  ;;  %v1199_v48 = vrot.slane %v1197_v45, 3  ;;  %v1202_v49 = vrot.slane %v1200_v46, 4 }
  0x4c   :  { %2087 = vmatmul.mubr.msk.bf16.gmra.mxu0 %vm59_vm2, %v2284_v20  ;;  %v1865_v20 = vld [vmem:[%s2946_s0 + $0x1c] sm:$0xe] }
  0x4d   :  { %2106 = vmatprep.mubr.msk.bf16.mxu0 %vm2306_vm1, %v2305_v0  ;;  %v1868_v21 = vcombine.low %v1865_v20, %v2566_v60 }
  0x4e   :  { %2121 = vmatmul.mubr.msk.bf16.vlgmr.msra.gmra.mxu1 %vm59_vm2, %v677_v51  ;;  %v1897_v51 = vld [vmem:[%s2946_s0 + $0x20] sm:$0x8] }
  0x4f   :  { %2147 = vmatpush3.bf16.msra.mxu1 %v2409_v41  ;;  %2124 = vmatprep.mubr.msk.bf16.mxu1 %vm2306_vm1, %v2305_v0  ;;  %v1856_v41 = vcombine.low %v1850_v59, %v2566_v60  ;;  %v1097_v22 = vrot.slane %v1868_v21, 1  ;;  %v1900_v55 = vcombine.low %v1897_v51, %v1882_v34  ;;  %v1371_v59 = vshrl.u32 %v1887_v42, 16 }
  0x50   :  { %2174 = vmatprep.subr.bf16.mxu1 %v2305_v0 }
  0x51   :  { %v936_v4 = vshll.u32 %v1856_v41, 16  ;;  %v1099_v25 = vsel %vm204_vm5, %v1097_v22, %v1098_v23  ;;  %v1472_v57 = vrot.slane %v1900_v55, 3 }
  0x53   :  { %v938_v6 = vrot.slane %v936_v4, 1 }
  0x54   :  { %2107 = vmatmul.mubr.msk.bf16.vlgmr.msra.gmra.mxu0 %vm59_vm2, %v588_v61  ;;  %v1377_v61 = vshll.u32 %v2297_v50, 16 }
  0x55   :  { %2133 = vmatpush3.bf16.msra.mxu0 %v2400_v37  ;;  %2110 = vmatprep.mubr.msk.bf16.mxu0 %vm2306_vm1, %v2305_v0  ;;  %v934_v37 = vshrl.u32 %v1856_v41, 16 }
  0x56   :  { %2125 = vmatmul.mubr.msk.bf16.gmra.mxu1 %vm59_vm2, %v686_v62  ;;  %2160 = vmatprep.subr.bf16.mxu0 %v2305_v0  ;;  %v1474_v62 = vsel %vm585_vm6, %v1472_v57, %v1473_v58 }
  0x57   :  { %2128 = vmatprep.mubr.msk.bf16.mxu1 %vm2306_vm1, %v2305_v0  ;;  %v939_v9 = vor.u32 %v938_v6, %v934_v37  ;;  %v1381_v37 = vshrl.u32 %v2297_v50, 16 }
  0x59   :  { %v944_v13 = vsel %vm36_vm3, %v939_v9, %v943_v11  ;;  %v1559_v15 = vrot.slane %v1381_v37, 3 }
  0x5c   :  { %2111 = vmatmul.mubr.msk.bf16.gmra.mxu0 %vm59_vm2, %v590_v5 }
  0x5d   :  { %2114 = vmatprep.mubr.msk.bf16.mxu0 %vm2306_vm1, %v2305_v0 }
  0x5e   :  { %2129 = vmatmul.mubr.msk.bf16.gmra.mxu1 %vm59_vm2, %v681_v54 }
  0x5f   :  { %2148 = vmatprep.mubr.msk.bf16.mxu1 %vm2306_vm1, %v2305_v0 }
  0x64   :  { %2115 = vmatmul.mubr.msk.bf16.gmra.mxu0 %vm59_vm2, %v589_v1 }
  0x65   :  { %2134 = vmatprep.mubr.msk.bf16.mxu0 %vm2306_vm1, %v2305_v0 }
  0x66   :  { %2149 = vmatmul.mubr.msk.bf16.vlgmr.msra.gmra.mxu1 %vm59_vm2, %v944_v13  ;;  %v1555_v13 = vshll.u32 %v1900_v55, 16 }
  0x67   :  { %2175 = vmatpush3.bf16.msra.mxu1 %v2428_v53  ;;  %2152 = vmatprep.mubr.msk.bf16.mxu1 %vm2306_vm1, %v2305_v0  ;;  %v2291_v53 = vld [vmem:[%s2946_s0 + $0x10] sm:$0xff]  }
  0x68   :  { %2202 = vmatprep.subr.bf16.mxu1 %v2305_v0  ;;  %v1557_v17 = vrot.slane %v1555_v13, 4 }
  0x6c   :  { %2135 = vmatmul.mubr.msk.bf16.vlgmr.msra.gmra.mxu0 %vm59_vm2, %v2289_v18  ;;  %v1560_v18 = vrot.slane %v1377_v61, 4 }
  0x6d   :  { %2161 = vmatpush3.bf16.msra.mxu0 %v2425_v52  ;;  %2138 = vmatprep.mubr.msk.bf16.mxu0 %vm2306_vm1, %v2305_v0  ;;  %v953_v52 = vshrl.u32 %v2598_v12, 16 }
  0x6e   :  { %2153 = vmatmul.mubr.msk.bf16.gmra.mxu1 %vm59_vm2, %v952_v19  ;;  %2188 = vmatprep.subr.bf16.mxu0 %v2305_v0  ;;  %v2302_v19 = vld [vmem:[%s2946_s0 + $0x24] sm:$0xff]   ;;  %v1561_v20 = vor.u32 %v1560_v18, %v1559_v15 }
  0x6f   :  { %2156 = vmatprep.mubr.msk.bf16.mxu1 %vm2306_vm1, %v2305_v0 }
  0x74   :  { %2139 = vmatmul.mubr.msk.bf16.gmra.mxu0 %vm59_vm2, %v2291_v53 }
  0x75   :  { %2142 = vmatprep.mubr.msk.bf16.mxu0 %vm2306_vm1, %v2305_v0 }
  0x76   :  { %2157 = vmatmul.mubr.msk.bf16.gmra.mxu1 %vm59_vm2, %v953_v52 }
  0x77   :  { %2176 = vmatprep.mubr.msk.bf16.mxu1 %vm2306_vm1, %v2305_v0 }
  0x7c   :  { %2143 = vmatmul.mubr.msk.bf16.gmra.mxu0 %vm59_vm2, %v2292_v24 }
  0x7d   :  { %2162 = vmatprep.mubr.msk.bf16.mxu0 %vm2306_vm1, %v2305_v0 }
  0x7e   :  { %2177 = vmatmul.mubr.msk.bf16.vlgmr.msra.gmra.mxu1 %vm59_vm2, %v1099_v25 }
  0x7f   :  { %2203 = vmatpush3.bf16.msra.mxu1 %v2462_v3  ;;  %2180 = vmatprep.mubr.msk.bf16.mxu1 %vm2306_vm1, %v2305_v0  ;;  %v1873_v3 = vld [vmem:[%s2946_s0 + $0x1c] sm:$0x8] }
  0x80   :  { %2230 = vmatprep.subr.bf16.mxu1 %v2305_v0  ;;  %v1876_v31 = vcombine.low %v1873_v3, %v2566_v60  ;;  %v1375_v60 = vrot.slane %v1373_v56, 1 }
  0x82   :  { %v1188_v32 = vshll.u32 %v1876_v31, 16  ;;  %v1376_v1 = vor.u32 %v1375_v60, %v1371_v59 }
  0x84   :  { %2163 = vmatmul.mubr.msk.bf16.vlgmr.msra.gmra.mxu0 %vm59_vm2, %v1856_v41  ;;  %v1190_v38 = vrot.slane %v1188_v32, 4  ;;  %v2301_v41 = vld [vmem:[%s2946_s0 + $0x30] ss:$0 sps:$4 sm:$0xff]  }
  0x85   :  { %2189 = vmatpush3.bf16.msra.mxu0 %v2455_v63  ;;  %2166 = vmatprep.mubr.msk.bf16.mxu0 %vm2306_vm1, %v2305_v0  ;;  %v1185_v63 = vshrl.u32 %v1876_v31, 16  ;;  %v1475_v4 = vrot.slane %v2301_v41, 3  ;;  %v1564_v52 = vshrl.u32 %v2301_v41, 16  ;;  %v1567_v21 = vshll.u32 %v2301_v41, 16 }
  0x86   :  { %2181 = vmatmul.mubr.msk.bf16.gmra.mxu1 %vm59_vm2, %v1101_v30  ;;  %2216 = vmatprep.subr.bf16.mxu0 %v2305_v0  ;;  %v2303_v30 = vld [vmem:[%s2946_s0 + $0x2c] sm:$0xff]  }
  0x87   :  { %2184 = vmatprep.mubr.msk.bf16.mxu1 %vm2306_vm1, %v2305_v0  ;;  %v1187_v36 = vrot.slane %v1185_v63, 3  ;;  %v1476_v7 = vsel %vm585_vm6, %v1473_v58, %v1475_v4  ;;  %v1566_v25 = vrot.slane %v1564_v52, 3  ;;  %v1569_v26 = vrot.slane %v1567_v21, 4 }
  0x89   :  { %v1191_v43 = vor.u32 %v1190_v38, %v1187_v36  ;;  %v1570_v32 = vor.u32 %v1569_v26, %v1566_v25  ;;  %v909_v36 = vld [vmem:[%s2947_s3 + $0x18] sm:$0x1]  ;;  %v1936_v38 = vld [vmem:[%s2947_s3 + $0x34] sm:$0x1] }
  0x8b   :  { %v1195_v47 = vsel %vm293_vm4, %v1191_v43, %v1194_v44  ;;  %v1788_v43 = vsel %vm2772_vm10, 0, %v1936_v38  ;;  %v1571_v45 = vsel %vm293_vm4, %v1561_v20, %v1570_v32 }
  0x8c   :  { %2167 = vmatmul.mubr.msk.bf16.gmra.mxu0 %vm59_vm2, %v2583_v2  ;;  %v1379_v2 = vrot.slane %v1377_v61, 1  ;;  %1937 = vst [vmem:[%s2947_s3 + $0x34] sm:$0x1] %v1788_v43 }
  0x8d   :  { %2170 = vmatprep.mubr.msk.bf16.mxu0 %vm2306_vm1, %v2305_v0 }
  0x8e   :  { %2185 = vmatmul.mubr.msk.bf16.gmra.mxu1 %vm59_vm2, %v1100_v28  ;;  %v1380_v5 = vsel %vm36_vm3, %v1376_v1, %v1379_v2  ;;  %v1383_v9 = vor.u32 %v1381_v37, %v1379_v2 }
  0x8f   :  { %2204 = vmatprep.mubr.msk.bf16.mxu1 %vm2306_vm1, %v2305_v0 }
  0x94   :  { %2171 = vmatmul.mubr.msk.bf16.gmra.mxu0 %vm59_vm2, %v2598_v12  ;;  %v1552_v12 = vshrl.u32 %v1900_v55, 16 }
  0x95   :  { %2190 = vmatprep.mubr.msk.bf16.mxu0 %vm2306_vm1, %v2305_v0 }
  0x96   :  { %2205 = vmatmul.mubr.msk.bf16.vlgmr.msra.gmra.mxu1 %vm59_vm2, %v1887_v42  ;;  %v1554_v16 = vrot.slane %v1552_v12, 3  ;;  %v910_v42 = vsel %vm2772_vm10, 0, %v909_v36 }
  0x97   :  { %2231 = vmatpush3.bf16.msra.mxu1 %v2477_v10  ;;  %2208 = vmatprep.mubr.msk.bf16.mxu1 %vm2306_vm1, %v2305_v0  ;;  %v1203_v10 = vor.u32 %v1202_v49, %v1199_v48  ;;  %911 = vst [vmem:[%s2947_s3 + $0x18] sm:$0x1] %v910_v42 }
  0x98   :  { %2258 = vmatprep.subr.bf16.mxu1 %v2305_v0  ;;  %v1558_v53 = vor.u32 %v1557_v17, %v1554_v16 }
  0x99   :  { %v1204_v54 = vsel %vm293_vm4, %v1194_v44, %v1203_v10 }
  0x9a   :  { %v1562_v24 = vsel %vm293_vm4, %v1558_v53, %v1561_v20 }
  0x9c   :  { %2191 = vmatmul.mubr.msk.bf16.vlgmr.msra.gmra.mxu0 %vm59_vm2, %v1195_v47 }
  0x9d   :  { %2217 = vmatpush3.bf16.msra.mxu0 %v2470_v8  ;;  %2194 = vmatprep.mubr.msk.bf16.mxu0 %vm2306_vm1, %v2305_v0  ;;  %v2299_v8 = vld [vmem:[%s2946_s0 + $0x30] ss:$0 sps:$4 sm:$0x11]  }
  0x9e   :  { %2209 = vmatmul.mubr.msk.bf16.gmra.mxu1 %vm59_vm2, %v2297_v50  ;;  %2244 = vmatprep.subr.bf16.mxu0 %v2305_v0  ;;  %v1384_v6 = vshll.u32 %v2299_v8, 16  ;;  %v1388_v14 = vshrl.u32 %v2299_v8, 16 }
  0x9f   :  { %2212 = vmatprep.mubr.msk.bf16.mxu1 %vm2306_vm1, %v2305_v0 }
  0xa0   :  { %v1386_v11 = vrot.slane %v1384_v6, 1 }
  0xa4   :  { %2195 = vmatmul.mubr.msk.bf16.gmra.mxu0 %vm59_vm2, %v1204_v54 }
  0xa5   :  { %2198 = vmatprep.mubr.msk.bf16.mxu0 %vm2306_vm1, %v2305_v0 }
  0xa6   :  { %2213 = vmatmul.mubr.msk.bf16.gmra.mxu1 %vm59_vm2, %v2299_v8 }
  0xa7   :  { %2232 = vmatprep.mubr.msk.bf16.mxu1 %vm2306_vm1, %v2305_v0 }
  0xac   :  { %2199 = vmatmul.mubr.msk.bf16.gmra.mxu0 %vm59_vm2, %v1199_v48  ;;  %v2304_v48 = vld [vmem:[%s2946_s0 + $0x34] ss:$0 sps:$4 sm:$0x11]  }
  0xad   :  { %2218 = vmatprep.mubr.msk.bf16.mxu0 %vm2306_vm1, %v2305_v0 }
  0xae   :  { %2233 = vmatmul.mubr.msk.bf16.vlgmr.msra.gmra.mxu1 %vm59_vm2, %v1474_v62 }
  0xaf   :  { %2259 = vmatpush3.bf16.msra.mxu1 %v2521_v29  ;;  %2236 = vmatprep.mubr.msk.bf16.mxu1 %vm2306_vm1, %v2305_v0  ;;  %v2307_v29 = vmov 0  }
  0xb0   :  { %908 = vst.msk [vmem:[%s2947_s3 + $0x14] sm:$0xf] %vm891_vm7, %v2307_v29  ;;  %1935 = vst.msk [vmem:[%s2947_s3 + $0x30] sm:$0xf] %vm891_vm7, %v2307_v29 }
  0xb4   :  { %2219 = vmatmul.mubr.msk.bf16.vlgmr.msra.gmra.mxu0 %vm59_vm2, %v1380_v5 }
  0xb5   :  { %2245 = vmatpush3.bf16.msra.mxu0 %v2514_v27  ;;  %2222 = vmatprep.mubr.msk.bf16.mxu0 %vm2306_vm1, %v2305_v0  ;;  %v1387_v27 = vsel %vm36_vm3, %v1383_v9, %v1386_v11 }
  0xb6   :  { %2237 = vmatmul.mubr.msk.bf16.gmra.mxu1 %vm59_vm2, %v1476_v7 }
  0xb7   :  { %2240 = vmatprep.mubr.msk.bf16.mxu1 %vm2306_vm1, %v2305_v0 }
  0xbc   :  { %2223 = vmatmul.mubr.msk.bf16.gmra.mxu0 %vm59_vm2, %v1387_v27 }
  0xbd   :  { %2226 = vmatprep.mubr.msk.bf16.mxu0 %vm2306_vm1, %v2305_v0 }
  0xbe   :  { %2241 = vmatmul.mubr.msk.bf16.gmra.mxu1 %vm59_vm2, %v1475_v4 }
  0xbf   :  { %2260 = vmatprep.mubr.msk.bf16.mxu1 %vm2306_vm1, %v2305_v0 }
  0xc4   :  { %2227 = vmatmul.mubr.msk.bf16.gmra.mxu0 %vm59_vm2, %v1388_v14 }
  0xc5   :  { %2246 = vmatprep.mubr.msk.bf16.mxu0 %vm2306_vm1, %v2305_v0 }
  0xc6   :  { %v172_v22 = vpop.f32.mrf.mxu1  ;;  %2261 = vmatmul.mubr.msk.bf16.vlgmr.msra.gmra.mxu1 %vm59_vm2, %v2302_v19 }
  0xc7   :  { %2264 = vmatprep.mubr.msk.bf16.mxu1 %vm2306_vm1, %v2305_v0 }
  0xc8   :  { %v2038_v23 = vpop.f32.mrf.mxu1 }
  0xca   :  { %v175_v28 = vpop.f32.mrf.mxu1 }
  0xcc   :  { %v107_v3 = vpop.f32.mrf.mxu0  ;;  %2247 = vmatmul.mubr.msk.bf16.vlgmr.msra.gmra.mxu0 %vm59_vm2, %v1562_v24  ;;  %v2039_v31 = vpop.f32.mrf.mxu1 }
  0xcd   :  { %v173_v63 = vadd.f32 %v172_v22, %v107_v3  ;;  %2250 = vmatprep.mubr.msk.bf16.mxu0 %vm2306_vm1, %v2305_v0 }
  0xce   :  { %v2024_v33 = vpop.f32.mrf.mxu0  ;;  %v180_v34 = vpop.f32.mrf.mxu1  ;;  %2265 = vmatmul.mubr.msk.bf16.gmra.mxu1 %vm59_vm2, %v2303_v30 }
  0xcf   :  { %2268 = vmatprep.mubr.msk.bf16.mxu1 %vm2306_vm1, %v2305_v0 }
  0xd0   :  { %v110_v39 = vpop.f32.mrf.mxu0  ;;  %v2042_v40 = vpop.f32.mrf.mxu1 }
  0xd1   :  { %v176_v44 = vadd.f32 %v175_v28, %v110_v39 }
  0xd2   :  { %v2025_v46 = vpop.f32.mrf.mxu0  ;;  %v183_v47 = vpop.f32.mrf.mxu1 }
  0xd4   :  { %v115_v49 = vpop.f32.mrf.mxu0  ;;  %2251 = vmatmul.mubr.msk.bf16.gmra.mxu0 %vm59_vm2, %v1571_v45  ;;  %v2043_v50 = vpop.f32.mrf.mxu1 }
  0xd5   :  { %v181_v10 = vadd.f32 %v180_v34, %v115_v49  ;;  %2254 = vmatprep.mubr.msk.bf16.mxu0 %vm2306_vm1, %v2305_v0 }
  0xd6   :  { %v2028_v51 = vpop.f32.mrf.mxu0  ;;  %v188_v54 = vpop.f32.mrf.mxu1  ;;  %2269 = vmatmul.mubr.msk.bf16.gmra.mxu1 %vm59_vm2, %v2304_v48 }
  0xd8   :  { %v118_v8 = vpop.f32.mrf.mxu0  ;;  %v2046_v55 = vpop.f32.mrf.mxu1 }
  0xd9   :  { %v184_v56 = vadd.f32 %v183_v47, %v118_v8 }
  0xda   :  { %v2029_v57 = vpop.f32.mrf.mxu0  ;;  %v191_v58 = vpop.f32.mrf.mxu1 }
  0xdc   :  { %v123_v59 = vpop.f32.mrf.mxu0  ;;  %2255 = vmatmul.mubr.msk.bf16.gmra.mxu0 %vm59_vm2, %v1566_v25  ;;  %v2047_v60 = vpop.f32.mrf.mxu1 }
  0xdd   :  { %v189_v61 = vadd.f32 %v188_v54, %v123_v59 }
  0xde   :  { %v2032_v62 = vpop.f32.mrf.mxu0  ;;  %v361_v41 = vpop.f32.mrf.mxu1 }
  0xe0   :  { %v126_v1 = vpop.f32.mrf.mxu0  ;;  %v2066_v2 = vpop.f32.mrf.mxu1 }
  0xe2   :  { %v2033_v4 = vpop.f32.mrf.mxu0  ;;  %v364_v0 = vpop.f32.mrf.mxu1 }
  0xe4   :  { %v256_v5 = vpop.f32.mrf.mxu0  ;;  %v2067_v37 = vpop.f32.mrf.mxu1 }
  0xe5   :  { %v278_v6 = vadd.f32 %v256_v5, %v173_v63 }
  0xe6   :  { %v2052_v7 = vpop.f32.mrf.mxu0  ;;  %v369_v9 = vpop.f32.mrf.mxu1 }
  0xe7   :  { %v2801_v11 = vadd.f32 %v361_v41, %v278_v6 }
  0xe8   :  { %v259_v29 = vpop.f32.mrf.mxu0  ;;  %v2070_v27 = vpop.f32.mrf.mxu1 }
  0xe9   :  { %v279_v12 = vadd.f32 %v259_v29, %v176_v44 }
  0xea   :  { %v2053_v13 = vpop.f32.mrf.mxu0  ;;  %v372_v14 = vpop.f32.mrf.mxu1 }
  0xeb   :  { %v2803_v15 = vadd.f32 %v364_v0, %v279_v12 }
  0xec   :  { %v264_v16 = vpop.f32.mrf.mxu0  ;;  %v2071_v17 = vpop.f32.mrf.mxu1 }
  0xed   :  { %v280_v18 = vadd.f32 %v264_v16, %v181_v10 }
  0xee   :  { %v2056_v19 = vpop.f32.mrf.mxu0  ;;  %v377_v53 = vpop.f32.mrf.mxu1 }
  0xef   :  { %v2805_v20 = vadd.f32 %v369_v9, %v280_v18 }
  0xf0   :  { %v267_v52 = vpop.f32.mrf.mxu0  ;;  %v2074_v21 = vpop.f32.mrf.mxu1 }
  0xf1   :  { %v281_v22 = vadd.f32 %v267_v52, %v184_v56 }
  0xf2   :  { %v2057_v23 = vpop.f32.mrf.mxu0  ;;  %v380_v24 = vpop.f32.mrf.mxu1 }
  0xf3   :  { %v2807_v25 = vadd.f32 %v372_v14, %v281_v22 }
  0xf4   :  { %v272_v26 = vpop.f32.mrf.mxu0  ;;  %v2075_v28 = vpop.f32.mrf.mxu1 }
  0xf5   :  { %v282_v30 = vadd.f32 %v272_v26, %v189_v61 }
  0xf6   :  { %v2060_v3 = vpop.f32.mrf.mxu0  ;;  %v548_v31 = vpop.f32.mrf.mxu1 }
  0xf7   :  { %v2809_v63 = vadd.f32 %v377_v53, %v282_v30 }
  0xf8   :  { %v275_v32 = vpop.f32.mrf.mxu0  ;;  %v2094_v33 = vpop.f32.mrf.mxu1 }
  0xfa   :  { %v2061_v34 = vpop.f32.mrf.mxu0  ;;  %v551_v36 = vpop.f32.mrf.mxu1 }
  0xfc   :  { %v454_v38 = vpop.f32.mrf.mxu0  ;;  %v2095_v39 = vpop.f32.mrf.mxu1 }
  0xfd   :  { %v476_v14 = vadd.f32 %v454_v38, %v2801_v11 }
  0xfe   :  { %v2080_v40 = vpop.f32.mrf.mxu0  ;;  %v556_v42 = vpop.f32.mrf.mxu1 }
  0xff   :  { %v570_v52 = vadd.f32 %v548_v31, %v476_v14 }
 0x100   :  { %v457_v43 = vpop.f32.mrf.mxu0  ;;  %v2098_v44 = vpop.f32.mrf.mxu1 }
 0x101   :  { %v477_v53 = vadd.f32 %v457_v43, %v2803_v15  ;;  %v2827_v15 = vld [vmem:[%s2948_s2] ss:$0 sm:$0xff] }
 0x102   :  { %v2081_v45 = vpop.f32.mrf.mxu0  ;;  %v2811_v46 = vpop.f32.mrf.mxu1 }
 0x103   :  { %v571_v30 = vadd.f32 %v551_v36, %v477_v53 }
 0x104   :  { %v462_v47 = vpop.f32.mrf.mxu0  ;;  %v2099_v48 = vpop.f32.mrf.mxu1 }
 0x105   :  { %v478_v28 = vadd.f32 %v462_v47, %v2805_v20 }
 0x106   :  { %v2084_v49 = vpop.f32.mrf.mxu0  ;;  %v2813_v50 = vpop.f32.mrf.mxu1 }
 0x107   :  { %v572_v39 = vadd.f32 %v556_v42, %v478_v28 }
 0x108   :  { %v465_v10 = vpop.f32.mrf.mxu0  ;;  %v2102_v51 = vpop.f32.mrf.mxu1 }
 0x109   :  { %v479_v38 = vadd.f32 %v465_v10, %v2807_v25 }
 0x10a   :  { %v2085_v54 = vpop.f32.mrf.mxu0  ;;  %v567_v8 = vpop.f32.mrf.mxu1 }
 0x10b   :  { %v573_v51 = vadd.f32 %v2811_v46, %v479_v38 }
 0x10c   :  { %v470_v55 = vpop.f32.mrf.mxu0  ;;  %v2103_v56 = vpop.f32.mrf.mxu1 }
 0x10d   :  { %v480_v49 = vadd.f32 %v470_v55, %v2809_v63 }
 0x10e   :  { %v2088_v57 = vpop.f32.mrf.mxu0  ;;  %v733_v58 = vpop.f32.mrf.mxu1 }
 0x110   :  { %v473_v59 = vpop.f32.mrf.mxu0  ;;  %v2122_v60 = vpop.f32.mrf.mxu1 }
 0x112   :  { %v2089_v61 = vpop.f32.mrf.mxu0  ;;  %v736_v62 = vpop.f32.mrf.mxu1 }
 0x113   :  { %v574_v61 = vadd.f32 %v2813_v50, %v480_v49 }
 0x114   :  { %v637_v41 = vpop.f32.mrf.mxu0  ;;  %v2123_v1 = vpop.f32.mrf.mxu1 }
 0x115   :  { %v659_v23 = vadd.f32 %v637_v41, %v570_v52 }
 0x116   :  { %v2108_v2 = vpop.f32.mrf.mxu0  ;;  %v741_v4 = vpop.f32.mrf.mxu1 }
 0x117   :  { %v755_v33 = vadd.f32 %v733_v58, %v659_v23 }
 0x118   :  { %v640_v0 = vpop.f32.mrf.mxu0  ;;  %v2126_v5 = vpop.f32.mrf.mxu1 }
 0x119   :  { %v660_v11 = vadd.f32 %v640_v0, %v571_v30 }
 0x11a   :  { %v2109_v37 = vpop.f32.mrf.mxu0  ;;  %v744_v6 = vpop.f32.mrf.mxu1 }
 0x11b   :  { %v756_v45 = vadd.f32 %v736_v62, %v660_v11 }
 0x11c   :  { %v645_v7 = vpop.f32.mrf.mxu0  ;;  %v2127_v9 = vpop.f32.mrf.mxu1 }
 0x11d   :  { %v661_v20 = vadd.f32 %v645_v7, %v572_v39 }
 0x11e   :  { %v2112_v29 = vpop.f32.mrf.mxu0  ;;  %v2815_v27 = vpop.f32.mrf.mxu1 }
 0x11f   :  { %v757_v58 = vadd.f32 %v741_v4, %v661_v20 }
 0x120   :  { %v648_v12 = vpop.f32.mrf.mxu0  ;;  %v2130_v13 = vpop.f32.mrf.mxu1 }
 0x121   :  { %v662_v25 = vadd.f32 %v648_v12, %v573_v51 }
 0x122   :  { %v2113_v16 = vpop.f32.mrf.mxu0  ;;  %v752_v17 = vpop.f32.mrf.mxu1 }
 0x123   :  { %v758_v0 = vadd.f32 %v744_v6, %v662_v25 }
 0x124   :  { %v653_v18 = vpop.f32.mrf.mxu0  ;;  %v2131_v19 = vpop.f32.mrf.mxu1 }
 0x125   :  { %v663_v41 = vadd.f32 %v653_v18, %v574_v61 }
 0x126   :  { %v2116_v21 = vpop.f32.mrf.mxu0  ;;  %v2819_v22 = vpop.f32.mrf.mxu1 }
 0x127   :  { %v759_v13 = vadd.f32 %v2815_v27, %v663_v41 }
 0x128   :  { %v656_v24 = vpop.f32.mrf.mxu0  ;;  %v2150_v26 = vpop.f32.mrf.mxu1 }
 0x129   :  { %v899_v24 = vld [vmem:[%s2947_s3 + $0x10] sm:$0x1] }
 0x12a   :  { %v2117_v3 = vpop.f32.mrf.mxu0  ;;  %v2822_v32 = vpop.f32.mrf.mxu1 }
 0x12c   :  { %v826_v34 = vpop.f32.mrf.mxu0  ;;  %v2151_v31 = vpop.f32.mrf.mxu1 }
 0x12d   :  { %v848_v40 = vadd.f32 %v826_v34, %v755_v33 }
 0x12e   :  { %v2136_v43 = vpop.f32.mrf.mxu0  ;;  %v2830_v44 = vpop.f32.mrf.mxu1 }
 0x12f   :  { %v860_v36 = vadd.f32 %v2827_v15, %v848_v40 }
 0x130   :  { %v829_v47 = vpop.f32.mrf.mxu0  ;;  %v2154_v48 = vpop.f32.mrf.mxu1 }
 0x131   :  { %v865_v54 = vmax.f32 %v860_v36, 0.0  ;;  %v849_v8 = vadd.f32 %v829_v47, %v756_v45 }
 0x132   :  { %v2137_v56 = vpop.f32.mrf.mxu0  ;;  %v2835_v57 = vpop.f32.mrf.mxu1 }
 0x133   :  { %v1938_v42 = vpack.c.bf16 %v865_v54, %v865_v54  ;;  %v861_v10 = vadd.f32 %v2827_v15, %v849_v8 }
 0x134   :  { %v834_v59 = vpop.f32.mrf.mxu0  ;;  %v2155_v60 = vpop.f32.mrf.mxu1 }
 0x135   :  { %892 = vst.msk [vmem:[%s2947_s3] sm:$0xf] %vm891_vm7, %v1938_v42  ;;  %v866_v63 = vmax.f32 %v861_v10, 0.0  ;;  %v850_v46 = vadd.f32 %v834_v59, %v757_v58 }
 0x136   :  { %v2140_v55 = vpop.f32.mrf.mxu0  ;;  %v2843_v62 = vpop.f32.mrf.mxu1 }
 0x137   :  { %v1939_v1 = vpack.c.bf16 %v866_v63, %v866_v63  ;;  %v862_v2 = vadd.f32 %v2827_v15, %v850_v46 }
 0x138   :  { %v837_v4 = vpop.f32.mrf.mxu0  ;;  %v2158_v5 = vpop.f32.mrf.mxu1 }
 0x139   :  { %893 = vst.msk [vmem:[%s2947_s3 + $0x4] sm:$0xf] %vm891_vm7, %v1939_v1  ;;  %v867_v50 = vmax.f32 %v862_v2, 0.0  ;;  %v851_v37 = vadd.f32 %v837_v4, %v758_v0 }
 0x13a   :  { %v2141_v7 = vpop.f32.mrf.mxu0  ;;  %v1020_v9 = vpop.f32.mrf.mxu1 }
 0x13b   :  { %v1940_v29 = vpack.c.bf16 %v867_v50, %v867_v50  ;;  %v863_v12 = vadd.f32 %v2827_v15, %v851_v37 }
 0x13c   :  { %v842_v14 = vpop.f32.mrf.mxu0  ;;  %v2159_v16 = vpop.f32.mrf.mxu1 }
 0x13d   :  { %894 = vst.msk [vmem:[%s2947_s3 + $0x8] sm:$0xf] %vm891_vm7, %v1940_v29  ;;  %v868_v6 = vmax.f32 %v863_v12, 0.0  ;;  %v852_v17 = vadd.f32 %v842_v14, %v759_v13 }
 0x13e   :  { %v2144_v18 = vpop.f32.mrf.mxu0  ;;  %v1148_v19 = vpop.f32.mrf.mxu1 }
 0x13f   :  { %v1941_v53 = vpack.c.bf16 %v868_v6, %v868_v6  ;;  %v864_v52 = vadd.f32 %v2827_v15, %v852_v17 }
 0x140   :  { %v845_v21 = vpop.f32.mrf.mxu0  ;;  %v2178_v23 = vpop.f32.mrf.mxu1 }
 0x141   :  { %895 = vst.msk [vmem:[%s2947_s3 + $0xc] sm:$0xf] %vm891_vm7, %v1941_v53  ;;  %v869_v27 = vmax.f32 %v864_v52, 0.0 }
 0x142   :  { %v2145_v26 = vpop.f32.mrf.mxu0  ;;  %v1151_v28 = vpop.f32.mrf.mxu1 }
 0x143   :  { %v1942_v30 = vpack.c.bf16 %v869_v27, %v869_v27 }
 0x144   :  { %v1066_v3 = vpop.f32.mrf.mxu0  ;;  %v2179_v11 = vpop.f32.mrf.mxu1 }
 0x145   :  { %v900_v33 = vsel %vm2772_vm10, %v1942_v30, %v899_v24  ;;  %v1067_v34 = vadd.f32 %v1066_v3, %v2819_v22 }
 0x146   :  { %901 = vst [vmem:[%s2947_s3 + $0x10] sm:$0x1] %v900_v33  ;;  %v2164_v31 = vpop.f32.mrf.mxu0  ;;  %v1156_v38 = vpop.f32.mrf.mxu1 }
 0x147   :  { %v2870_v39 = vadd.f32 %v1148_v19, %v1067_v34 }
 0x148   :  { %v1069_v40 = vpop.f32.mrf.mxu0  ;;  %v2182_v43 = vpop.f32.mrf.mxu1 }
 0x149   :  { %v1070_v20 = vadd.f32 %v1069_v40, %v2822_v32 }
 0x14a   :  { %v2165_v36 = vpop.f32.mrf.mxu0  ;;  %v1159_v45 = vpop.f32.mrf.mxu1 }
 0x14b   :  { %v2878_v22 = vadd.f32 %v1151_v28, %v1070_v20 }
 0x14c   :  { %v1074_v48 = vpop.f32.mrf.mxu0  ;;  %v2183_v49 = vpop.f32.mrf.mxu1 }
 0x14d   :  { %v905_v51 = vld [vmem:[%s2947_s3 + $0x10] sm:$0xf]  ;;  %v1075_v54 = vadd.f32 %v1074_v48, %v2830_v44 }
 0x14e   :  { %v906_v32 = vsel %vm2874_vm12, 0, %v905_v51  ;;  %v2168_v8 = vpop.f32.mrf.mxu0  ;;  %v1164_v56 = vpop.f32.mrf.mxu1 }
 0x14f   :  { %907 = vst [vmem:[%s2947_s3 + $0x10] sm:$0xf] %v906_v32  ;;  %v2889_v25 = vadd.f32 %v1156_v38, %v1075_v54 }
 0x150   :  { %v1077_v42 = vpop.f32.mrf.mxu0  ;;  %v2186_v10 = vpop.f32.mrf.mxu1 }
 0x151   :  { %v1078_v58 = vadd.f32 %v1077_v42, %v2835_v57 }
 0x152   :  { %v2169_v59 = vpop.f32.mrf.mxu0  ;;  %v1167_v60 = vpop.f32.mrf.mxu1 }
 0x153   :  { %v2892_v61 = vadd.f32 %v1159_v45, %v1078_v58 }
 0x154   :  { %v1082_v44 = vpop.f32.mrf.mxu0  ;;  %v2187_v63 = vpop.f32.mrf.mxu1 }
 0x155   :  { %v1083_v46 = vadd.f32 %v1082_v44, %v2843_v62 }
 0x156   :  { %v2172_v55 = vpop.f32.mrf.mxu0  ;;  %v1343_v41 = vpop.f32.mrf.mxu1 }
 0x157   :  { %v2895_v1 = vadd.f32 %v1164_v56, %v1083_v46 }
 0x158   :  { %v1085_v2 = vpop.f32.mrf.mxu0  ;;  %v2206_v0 = vpop.f32.mrf.mxu1 }
 0x15a   :  { %v2173_v4 = vpop.f32.mrf.mxu0  ;;  %v1346_v5 = vpop.f32.mrf.mxu1 }
 0x15c   :  { %v1251_v50 = vpop.f32.mrf.mxu0  ;;  %v2207_v37 = vpop.f32.mrf.mxu1 }
 0x15d   :  { %v1273_v54 = vadd.f32 %v1251_v50, %v2870_v39 }
 0x15e   :  { %v2192_v7 = vpop.f32.mrf.mxu0  ;;  %v1351_v57 = vpop.f32.mrf.mxu1 }
 0x15f   :  { %v1365_v58 = vadd.f32 %v1343_v41, %v1273_v54 }
 0x160   :  { %v1254_v9 = vpop.f32.mrf.mxu0  ;;  %v2210_v29 = vpop.f32.mrf.mxu1 }
 0x161   :  { %v1274_v10 = vadd.f32 %v1254_v9, %v2878_v22 }
 0x162   :  { %v2193_v12 = vpop.f32.mrf.mxu0  ;;  %v1354_v13 = vpop.f32.mrf.mxu1 }
 0x163   :  { %v1366_v2 = vadd.f32 %v1346_v5, %v1274_v10 }
 0x164   :  { %v1259_v14 = vpop.f32.mrf.mxu0  ;;  %v2211_v16 = vpop.f32.mrf.mxu1 }
 0x165   :  { %v1275_v55 = vadd.f32 %v1259_v14, %v2889_v25 }
 0x166   :  { %v2196_v6 = vpop.f32.mrf.mxu0  ;;  %v2897_v62 = vpop.f32.mrf.mxu1 }
 0x167   :  { %v1367_v12 = vadd.f32 %v1351_v57, %v1275_v55 }
 0x168   :  { %v1262_v17 = vpop.f32.mrf.mxu0  ;;  %v2214_v18 = vpop.f32.mrf.mxu1 }
 0x169   :  { %v1276_v29 = vadd.f32 %v1262_v17, %v2892_v61 }
 0x16a   :  { %v2197_v19 = vpop.f32.mrf.mxu0  ;;  %v1362_v53 = vpop.f32.mrf.mxu1 }
 0x16b   :  { %v1368_v5 = vadd.f32 %v1354_v13, %v1276_v29 }
 0x16c   :  { %v1267_v52 = vpop.f32.mrf.mxu0  ;;  %v2215_v21 = vpop.f32.mrf.mxu1 }
 0x16d   :  { %v1277_v25 = vadd.f32 %v1267_v52, %v2895_v1 }
 0x16e   :  { %v2200_v23 = vpop.f32.mrf.mxu0  ;;  %v1523_v27 = vpop.f32.mrf.mxu1 }
 0x170   :  { %v1270_v24 = vpop.f32.mrf.mxu0  ;;  %v2234_v26 = vpop.f32.mrf.mxu1 }
 0x172   :  { %v2201_v28 = vpop.f32.mrf.mxu0  ;;  %v1526_v30 = vpop.f32.mrf.mxu1 }
 0x174   :  { %v1436_v3 = vpop.f32.mrf.mxu0  ;;  %v2235_v11 = vpop.f32.mrf.mxu1 }
 0x175   :  { %v1458_v44 = vadd.f32 %v1436_v3, %v1365_v58  ;;  %v1369_v3 = vadd.f32 %v2897_v62, %v1277_v25 }
 0x176   :  { %v2220_v33 = vpop.f32.mrf.mxu0  ;;  %v1531_v34 = vpop.f32.mrf.mxu1 }
 0x177   :  { %v1545_v7 = vadd.f32 %v1523_v27, %v1458_v44 }
 0x178   :  { %v1439_v31 = vpop.f32.mrf.mxu0  ;;  %v2238_v38 = vpop.f32.mrf.mxu1 }
 0x179   :  { %v1459_v37 = vadd.f32 %v1439_v31, %v1366_v2 }
 0x17a   :  { %v2221_v40 = vpop.f32.mrf.mxu0  ;;  %v1534_v43 = vpop.f32.mrf.mxu1 }
 0x17b   :  { %v1546_v18 = vadd.f32 %v1526_v30, %v1459_v37 }
 0x17c   :  { %v1444_v20 = vpop.f32.mrf.mxu0  ;;  %v2239_v36 = vpop.f32.mrf.mxu1 }
 0x17d   :  { %v1460_v9 = vadd.f32 %v1444_v20, %v1367_v12 }
 0x17e   :  { %v2224_v45 = vpop.f32.mrf.mxu0  ;;  %v2899_v48 = vpop.f32.mrf.mxu1 }
 0x17f   :  { %v1547_v57 = vadd.f32 %v1531_v34, %v1460_v9 }
 0x180   :  { %v1447_v49 = vpop.f32.mrf.mxu0  ;;  %v2242_v51 = vpop.f32.mrf.mxu1 }
 0x181   :  { %v1461_v24 = vadd.f32 %v1447_v49, %v1368_v5 }
 0x182   :  { %v2225_v32 = vpop.f32.mrf.mxu0  ;;  %v1542_v8 = vpop.f32.mrf.mxu1 }
 0x183   :  { %v1548_v40 = vadd.f32 %v1534_v43, %v1461_v24 }
 0x184   :  { %v1452_v56 = vpop.f32.mrf.mxu0  ;;  %v2243_v42 = vpop.f32.mrf.mxu1 }
 0x185   :  { %v1462_v13 = vadd.f32 %v1452_v56, %v1369_v3 }
 0x186   :  { %v2228_v59 = vpop.f32.mrf.mxu0  ;;  %v1710_v60 = vpop.f32.mrf.mxu1 }
 0x187   :  { %v1549_v8 = vadd.f32 %v2899_v48, %v1462_v13 }
 0x188   :  { %v1455_v63 = vpop.f32.mrf.mxu0  ;;  %v2262_v46 = vpop.f32.mrf.mxu1 }
 0x18a   :  { %v2229_v0 = vpop.f32.mrf.mxu0  ;;  %v1713_v4 = vpop.f32.mrf.mxu1 }
 0x18b   :  { %v1931_v0 = vld [vmem:[%s2947_s3 + $0x2c] sm:$0x1] }
 0x18c   :  { %v1618_v39 = vpop.f32.mrf.mxu0  ;;  %v2263_v50 = vpop.f32.mrf.mxu1 }
 0x18d   :  { %v1640_v16 = vadd.f32 %v1618_v39, %v1545_v7 }
 0x18e   :  { %v2248_v22 = vpop.f32.mrf.mxu0  ;;  %v1718_v41 = vpop.f32.mrf.mxu1 }
 0x18f   :  { %v1732_v6 = vadd.f32 %v1710_v60, %v1640_v16 }
 0x190   :  { %v1621_v19 = vpop.f32.mrf.mxu0  ;;  %v2266_v53 = vpop.f32.mrf.mxu1 }
 0x191   :  { %v1744_v14 = vadd.f32 %v2827_v15, %v1732_v6  ;;  %v1641_v21 = vadd.f32 %v1621_v19, %v1546_v18 }
 0x192   :  { %v2249_v23 = vpop.f32.mrf.mxu0  ;;  %v1721_v27 = vpop.f32.mrf.mxu1 }
 0x193   :  { %v1749_v26 = vmax.f32 %v1744_v14, 0.0  ;;  %v1733_v61 = vadd.f32 %v1713_v4, %v1641_v21 }
 0x194   :  { %v1626_v17 = vpop.f32.mrf.mxu0  ;;  %v2267_v28 = vpop.f32.mrf.mxu1 }
 0x195   :  { %v1943_v11 = vpack.c.bf16 %v1749_v26, %v1749_v26  ;;  %v1745_v30 = vadd.f32 %v2827_v15, %v1733_v61  ;;  %v1642_v33 = vadd.f32 %v1626_v17, %v1547_v57 }
 0x196   :  { %v2252_v31 = vpop.f32.mrf.mxu0  ;;  %v1726_v1 = vpop.f32.mrf.mxu1 }
 0x197   :  { %1927 = vst.msk [vmem:[%s2947_s3 + $0x1c] sm:$0xf] %vm891_vm7, %v1943_v11  ;;  %v1750_v52 = vmax.f32 %v1745_v30, 0.0  ;;  %v1734_v38 = vadd.f32 %v1718_v41, %v1642_v33 }
 0x198   :  { %v1629_v34 = vpop.f32.mrf.mxu0  ;;  %v2270_v20 = vpop.f32.mrf.mxu1 }
 0x199   :  { %v1944_v36 = vpack.c.bf16 %v1750_v52, %v1750_v52  ;;  %v1746_v62 = vadd.f32 %v2827_v15, %v1734_v38  ;;  %v1643_v45 = vadd.f32 %v1629_v34, %v1548_v40 }
 0x19a   :  { %v2253_v49 = vpop.f32.mrf.mxu0  ;;  %v1729_v51 = vpop.f32.mrf.mxu1 }
 0x19b   :  { %1928 = vst.msk [vmem:[%s2947_s3 + $0x20] sm:$0xf] %vm891_vm7, %v1944_v36  ;;  %v1751_v54 = vmax.f32 %v1746_v62, 0.0  ;;  %v1735_v32 = vadd.f32 %v1721_v27, %v1643_v45 }
 0x19c   :  { %v1634_v56 = vpop.f32.mrf.mxu0  ;;  %v2271_v42 = vpop.f32.mrf.mxu1 }
 0x19d   :  { %v1945_v43 = vpack.c.bf16 %v1751_v54, %v1751_v54  ;;  %v1747_v10 = vadd.f32 %v2827_v15, %v1735_v32  ;;  %v1644_v58 = vadd.f32 %v1634_v56, %v1549_v8 }
 0x19e   :  { %v2256_v59 = vpop.f32.mrf.mxu0 }
 0x19f   :  { %1929 = vst.msk [vmem:[%s2947_s3 + $0x24] sm:$0xf] %vm891_vm7, %v1945_v43  ;;  %v1752_v60 = vmax.f32 %v1747_v10, 0.0  ;;  %v1736_v44 = vadd.f32 %v1726_v1, %v1644_v58 }
 0x1a0   :  { %v1637_v63 = vpop.f32.mrf.mxu0 }
 0x1a1   :  { %v1946_v46 = vpack.c.bf16 %v1752_v60, %v1752_v60  ;;  %v1748_v55 = vadd.f32 %v2827_v15, %v1736_v44 }
 0x1a2   :  { %v2257_v2 = vpop.f32.mrf.mxu0 }
 0x1a3   :  { %1930 = vst.msk [vmem:[%s2947_s3 + $0x28] sm:$0xf] %vm891_vm7, %v1946_v46  ;;  %v1753_v48 = vmax.f32 %v1748_v55, 0.0 }
 0x1a5   :  { %v1947_v4 = vpack.c.bf16 %v1753_v48, %v1753_v48 }
 0x1a7   :  { %v1781_v37 = vsel %vm2772_vm10, %v1947_v4, %v1931_v0 }
 0x1a8   :  { %1932 = vst [vmem:[%s2947_s3 + $0x2c] sm:$0x1] %v1781_v37 }
 0x1af   :  { %v1933_v15 = vld [vmem:[%s2947_s3 + $0x2c] sm:$0xf] }
 0x1b0   :  { %v1784_v7 = vsel %vm2874_vm12, 0, %v1933_v15 }
 0x1b1   :  { %1934 = vst [vmem:[%s2947_s3 + $0x2c] sm:$0xf] %v1784_v7 }

</bundles_post_ra>
